<compile_context>
chip_gen: v7x
topology: tpu7x:2x2x1
jax: 0.10.0
libtpu: 0.0.40
codegen_flags: <defaults>
</compile_context>

<pallas_src>
import jax
import jax.numpy as jnp
import numpy as np
from jax import lax
from jax.experimental import pallas as pl
from jax.experimental.pallas import tpu as pltpu

K5 = 5          # conv kernel size
OC = 12         # output channels of every conv layer
NPAD = 128      # padded lane width of conv3 / FC output


# ----------------------------- Pallas kernel --------------------------------

def _lenet_kernel(in1_ref, w1_ref, b1_ref, w2_ref, b2_ref, w3_ref, b3_ref,
                  wf_ref, bf_ref, out_ref, act1_ref, act2_ref, fc_ref):
    B = out_ref.shape[0]                    # batch tile
    f32 = jnp.float32
    adt = act1_ref.dtype                    # bf16 activation storage

    k1 = in1_ref.shape[-1]                  # 96  = 32*3 (conv1 input lanes)
    n1 = act1_ref.shape[-1]                 # 192 = 16*12 (conv1 out lanes)
    n2 = act2_ref.shape[-1]                 # 96  =  8*12 (conv2 out lanes)
    n3 = w3_ref.shape[-1]                   # 128 (conv3 out lanes, zero-padded)

    # Zero only the vertical-halo rows; interiors are written exactly once.
    act1_ref[:, :, 0:1, :] = jnp.zeros((B, 2, 1, n1), adt)
    act1_ref[:, :, 9:10, :] = jnp.zeros((B, 2, 1, n1), adt)
    act2_ref[:, 0:2, :] = jnp.zeros((B, 2, n2), adt)
    act2_ref[:, 10:12, :] = jnp.zeros((B, 2, n2), adt)

    # ---- conv1 (stride 2, pad 2): 5 dense-K matmuls, the two output-row
    #      parities share each weight slab (stacked along the row dim). -------
    acc1 = None
    for i in range(K5):
        blocks = []
        for q in (0, 1):                    # output-row parity
            t = 2 * q + i                   # padded input row offset
            blocks.append(
                in1_ref[:, t % 4, t // 4:t // 4 + 8, :].reshape(B * 8, k1))
        lhs = jnp.concatenate(blocks, axis=0)              # (2B*8, 96) bf16
        d = jnp.dot(lhs, w1_ref[i], preferred_element_type=f32)
        acc1 = d if acc1 is None else acc1 + d
    h1 = jax.nn.sigmoid(acc1 + b1_ref[...]).astype(adt)    # (2B*8, 192)
    act1_ref[:, 0:1, 1:9, :] = h1[0:B * 8].reshape(B, 1, 8, n1)
    act1_ref[:, 1:2, 1:9, :] = h1[B * 8:2 * B * 8].reshape(B, 1, 8, n1)

    # ---- conv2 (stride 2, pad 2): 5 dense-K matmuls --------------------------
    acc2 = None
    for i in range(K5):
        lhs = act1_ref[:, i % 2, i // 2:i // 2 + 8, :].reshape(B * 8, n1)
        d = jnp.dot(lhs, w2_ref[i], preferred_element_type=f32)
        acc2 = d if acc2 is None else acc2 + d
    h2 = jax.nn.sigmoid(acc2 + b2_ref[...]).astype(adt)    # (B*8, 96)
    act2_ref[:, 2:10, :] = h2.reshape(B, 8, n2)

    # ---- conv3 (stride 1, pad 2): 5 dense-K matmuls --------------------------
    acc3 = None
    for i in range(K5):
        lhs = act2_ref[:, i:i + 8, :].reshape(B * 8, n2)
        d = jnp.dot(lhs, w3_ref[i], preferred_element_type=f32)
        acc3 = d if acc3 is None else acc3 + d
    h3 = jax.nn.sigmoid(acc3 + b3_ref[...])                 # (B*8, 128) f32
    # Lanes 96:128 hold sigmoid(0)=0.5 padding garbage; the matching FC weight
    # rows are zero, so they never contribute.

    # ---- fc: one dense (B, 1024) @ (1024, 128) matmul ------------------------
    # Assemble the FC operand with 8 lane-aligned 128-wide stores (avoids any
    # sublane->lane value reshape).
    h3 = h3.astype(adt).reshape(B, 8, n3)
    for h in range(8):
        fc_ref[:, h * n3:(h + 1) * n3] = h3[:, h, :]
    out_ref[...] = (jnp.dot(fc_ref[...], wf_ref[...],
                            preferred_element_type=f32) + bf_ref[...])


# ------------------------- host-side packing / glue -------------------------

def _prep_input(x):
    """(B, C, 32, 32) NCHW image -> (B, 4, 9, W*C) bf16.

    Rows are zero-padded by 2 (conv1 padding) to 36 and split by (row % 4) so
    the kernel's stride-2 row gathering for both output-row parities becomes a
    contiguous 8-row slice.  Lanes are channel-minor packed: lane = x*C + c.
    """
    B, C, H, W = x.shape
    xt = jnp.transpose(x, (0, 2, 3, 1)).reshape(B, H, W * C)
    xt = jnp.pad(xt, ((0, 0), (2, 2), (0, 0)))               # (B, 36, W*C)
    xt = xt.reshape(B, 9, 4, W * C).transpose(0, 2, 1, 3)    # (B, 4, 9, W*C)
    return xt.astype(jnp.bfloat16)


def _toeplitz_weights(w, x_in, x_out, stride, pad):
    """Fold horizontal taps + horizontal zero-padding + input channels of a
    conv weight (O, Ci, k, k) into one dense contraction dim, one slab per
    kernel row: T[i][xi*Ci + ci, xo*O + o] = w[o, ci, i, xi - stride*xo + pad].
    """
    w = np.asarray(w, np.float32)
    O, Ci, k, _ = w.shape
    T = np.zeros((k, x_in * Ci, x_out * O), np.float32)
    for i in range(k):
        for xo in range(x_out):
            for j in range(k):
                xi = stride * xo - pad + j
                if 0 <= xi < x_in:
                    T[i, xi * Ci:(xi + 1) * Ci, xo * O:(xo + 1) * O] = \
                        w[:, :, i, j].T
    return T


def pack_params(params, num_classes=10):
    """One-time host-side re-layout of torch-style weights into kernel layout."""
    bf16 = jnp.bfloat16
    t1 = _toeplitz_weights(params["w1"], 32, 16, 2, 2)        # (5,  96, 192)
    t2 = _toeplitz_weights(params["w2"], 16, 8, 2, 2)         # (5, 192,  96)
    t3 = _toeplitz_weights(params["w3"], 8, 8, 1, 2)          # (5,  96,  96)
    t3 = np.pad(t3, ((0, 0), (0, 0), (0, NPAD - t3.shape[-1])))   # N -> 128

    def tiled_bias(b, reps, width=None):
        v = np.tile(np.asarray(b, np.float32), reps)
        if width is not None:
            v = np.pad(v, (0, width - v.shape[0]))
        return jnp.asarray(v[None, :])                        # (1, lanes) f32

    # fc weight: torch flattens NCHW (12, 8, 8) -> feature = c*64 + h*8 + w.
    # Kernel FC operand lanes are h*128 + w*12 + c; rows 96:128 of each h-block
    # match conv3's zero-padded lanes and stay zero.
    wf = np.asarray(params["wf"], np.float32)                 # (ncls, 768)
    ncls = wf.shape[0]
    wfr = wf.reshape(ncls, OC, 8, 8)                          # [n, c, h, w]
    src = np.transpose(wfr, (2, 3, 1, 0)).reshape(8, 8 * OC, ncls)  # [h, w*12+c, n]
    wfp = np.zeros((8 * NPAD, NPAD), np.float32)
    for h in range(8):
        wfp[h * NPAD:h * NPAD + 8 * OC, :ncls] = src[h]
    bfp = np.pad(np.asarray(params["bf"], np.float32), (0, NPAD - ncls))[None, :]

    return {
        "w1p": jnp.asarray(t1, bf16), "b1p": tiled_bias(params["b1"], 16),
        "w2p": jnp.asarray(t2, bf16), "b2p": tiled_bias(params["b2"], 8),
        "w3p": jnp.asarray(t3, bf16), "b3p": tiled_bias(params["b3"], 8, NPAD),
        "wfp": jnp.asarray(wfp, bf16), "bfp": jnp.asarray(bfp),
    }


def lenet_forward_pallas(packed, x, num_classes=10):
    B, C, H, W = x.shape
    assert (H, W) == (32, 32), "fc expects 12*8*8 = 768 features (32x32 input)"
    in1 = _prep_input(x)                                      # (B, 4, 9, W*C)

    bt = 8 if B % 8 == 0 else B                               # batch tile
    grid = (B // bt,)

    args = (in1, packed["w1p"], packed["b1p"], packed["w2p"], packed["b2p"],
            packed["w3p"], packed["b3p"], packed["wfp"], packed["bfp"])

    def const_spec(a):                                        # VMEM-resident weights
        nd = a.ndim
        return pl.BlockSpec(a.shape, lambda b, _n=nd: (0,) * _n)

    in_specs = [pl.BlockSpec((bt,) + in1.shape[1:], lambda b: (b, 0, 0, 0))]
    in_specs += [const_spec(a) for a in args[1:]]

    n1, n2 = packed["w1p"].shape[-1], packed["w2p"].shape[-1]  # 192, 96
    flops = 2 * B * (5 * 16 * (W * C) * n1 + 5 * 8 * n1 * n2
                     + 5 * 8 * n2 * NPAD + 8 * NPAD * NPAD)
    transc = B * (16 * n1 + 8 * n2 + 8 * NPAD)
    bytes_accessed = (sum(int(a.size) * a.dtype.itemsize for a in args)
                      + B * NPAD * 4)

    out = pl.pallas_call(
        _lenet_kernel,
        out_shape=jax.ShapeDtypeStruct((B, NPAD), jnp.float32),
        grid=grid,
        in_specs=in_specs,
        out_specs=pl.BlockSpec((bt, NPAD), lambda b: (b, 0)),
        scratch_shapes=[
            pltpu.VMEM((bt, 2, 10, n1), jnp.bfloat16),  # conv1 out, parity-split rows + y-halo
            pltpu.VMEM((bt, 12, n2), jnp.bfloat16),     # conv2 out, y-halo'd
            pltpu.VMEM((bt, 8 * NPAD), jnp.bfloat16),   # FC operand (bt, 1024)
        ],
        compiler_params=pltpu.CompilerParams(
            dimension_semantics=("parallel",)),
        cost_estimate=pl.CostEstimate(flops=flops, transcendentals=transc,
                                      bytes_accessed=bytes_accessed),
    )(*args)
    return out[:, :num_classes]


# --------------------------- pure-JAX reference ------------------------------

def _conv_ref(x, w, b, stride, pad):
    y = lax.conv_general_dilated(
        x, w, window_strides=(stride, stride),
        padding=[(pad, pad), (pad, pad)],
        dimension_numbers=("NCHW", "OIHW", "NCHW"))
    return jax.nn.sigmoid(y + b[None, :, None, None])


def lenet_forward_ref(params, x):
    out = _conv_ref(x, params["w1"], params["b1"], 2, 2)
    out = _conv_ref(out, params["w2"], params["b2"], 2, 2)
    out = _conv_ref(out, params["w3"], params["b3"], 1, 2)
    out = out.reshape(out.shape[0], -1)                # torch .view(B, -1) on NCHW
    return out @ params["wf"].T + params["bf"]


# ---------------------------------- main --------------------------------------

def init_params(key, channel=3, num_classes=10):
    ks = jax.random.split(key, 8)
    s = 0.1
    return {
        "w1": s * jax.random.normal(ks[0], (12, channel, 5, 5), jnp.float32),
        "b1": s * jax.random.normal(ks[1], (12,), jnp.float32),
        "w2": s * jax.random.normal(ks[2], (12, 12, 5, 5), jnp.float32),
        "b2": s * jax.random.normal(ks[3], (12,), jnp.float32),
        "w3": s * jax.random.normal(ks[4], (12, 12, 5, 5), jnp.float32),
        "b3": s * jax.random.normal(ks[5], (12,), jnp.float32),
        "wf": s * jax.random.normal(ks[6], (num_classes, 768), jnp.float32),
        "bf": s * jax.random.normal(ks[7], (num_classes,), jnp.float32),
    }


if __name__ == "__main__":
    key = jax.random.PRNGKey(0)
    pkey, xkey = jax.random.split(key)
    params = init_params(pkey, channel=3, num_classes=10)
    # fc expects 768 = 12*8*8 features -> 32x32 input (CIFAR-like).
    x = jax.random.normal(xkey, (2, 3, 32, 32), jnp.float32)

    packed = pack_params(params, num_classes=10)       # one-time host-side packing
    fwd = jax.jit(lenet_forward_pallas)
    out = jax.block_until_ready(fwd(packed, x))

    ref = jax.block_until_ready(jax.jit(lenet_forward_ref)(params, x))

    assert out.shape == (2, 10), out.shape
    err = float(jnp.max(jnp.abs(out - ref)))
    # bf16 matmul operands & bf16 inter-layer activations -> ~1e-2 logit error.
    assert err < 8e-2, f"mismatch vs f32 reference, max abs err = {err:e}"
    print("KERNEL_OK")
</pallas_src>

<mosaic_0001>
module attributes {stable_mosaic.version = 11 : i64} {
  func.func @_lenet_kernel(%arg0: i32, %arg1: memref<2x4x9x96xbf16, #tpu.memory_space<vmem>>, %arg2: memref<5x96x192xbf16, #tpu.memory_space<vmem>>, %arg3: memref<1x192xf32, #tpu.memory_space<vmem>>, %arg4: memref<5x192x96xbf16, #tpu.memory_space<vmem>>, %arg5: memref<1x96xf32, #tpu.memory_space<vmem>>, %arg6: memref<5x96x128xbf16, #tpu.memory_space<vmem>>, %arg7: memref<1x128xf32, #tpu.memory_space<vmem>>, %arg8: memref<1024x128xbf16, #tpu.memory_space<vmem>>, %arg9: memref<1x128xf32, #tpu.memory_space<vmem>>, %arg10: memref<2x128xf32, #tpu.memory_space<vmem>>, %arg11: memref<2x2x10x192xbf16, #tpu.memory_space<vmem>>, %arg12: memref<2x12x96xbf16, #tpu.memory_space<vmem>>, %arg13: memref<2x1024xbf16, #tpu.memory_space<vmem>>) attributes {dimension_semantics = [#tpu.dimension_semantics<parallel>], iteration_bounds = array<i64: 1>, scalar_prefetch = 0 : i64, scratch_operands = 3 : i64, tpu.core_type = #tpu.core_type<tc>, window_params = [{transform_indices = @transform_0, window_bounds = array<i64: 2, 4, 9, 96>}, {pipeline_mode = #tpu.pipeline_mode<synchronous>, transform_indices = @transform_1, window_bounds = array<i64: 5, 96, 192>}, {pipeline_mode = #tpu.pipeline_mode<synchronous>, transform_indices = @transform_2, window_bounds = array<i64: 1, 192>}, {pipeline_mode = #tpu.pipeline_mode<synchronous>, transform_indices = @transform_3, window_bounds = array<i64: 5, 192, 96>}, {pipeline_mode = #tpu.pipeline_mode<synchronous>, transform_indices = @transform_4, window_bounds = array<i64: 1, 96>}, {pipeline_mode = #tpu.pipeline_mode<synchronous>, transform_indices = @transform_5, window_bounds = array<i64: 5, 96, 128>}, {pipeline_mode = #tpu.pipeline_mode<synchronous>, transform_indices = @transform_6, window_bounds = array<i64: 1, 128>}, {pipeline_mode = #tpu.pipeline_mode<synchronous>, transform_indices = @transform_7, window_bounds = array<i64: 1024, 128>}, {pipeline_mode = #tpu.pipeline_mode<synchronous>, transform_indices = @transform_8, window_bounds = array<i64: 1, 128>}, {transform_indices = @transform_9, window_bounds = array<i64: 2, 128>}]} {
    %cst = arith.constant 0.000000e+00 : bf16
    %0 = vector.broadcast %cst : bf16 to vector<2x2x1x192xbf16>
    %c0 = arith.constant 0 : index
    %c0_0 = arith.constant 0 : index
    %c0_1 = arith.constant 0 : index
    %c0_2 = arith.constant 0 : index
    %1 = vector.load %arg11[%c0, %c0_0, %c0_1, %c0_2] : memref<2x2x10x192xbf16, #tpu.memory_space<vmem>>, vector<2x2x1x192xbf16>
    tpu.vector_store %arg11[%c0, %c0_0, %c0_1, %c0_2], %0 {strides = array<i32>} : memref<2x2x10x192xbf16, #tpu.memory_space<vmem>>, vector<2x2x1x192xbf16>,
    %cst_3 = arith.constant 0.000000e+00 : bf16
    %2 = vector.broadcast %cst_3 : bf16 to vector<2x2x1x192xbf16>
    %c0_4 = arith.constant 0 : index
    %c0_5 = arith.constant 0 : index
    %c9 = arith.constant 9 : index
    %c0_6 = arith.constant 0 : index
    %3 = vector.load %arg11[%c0_4, %c0_5, %c9, %c0_6] : memref<2x2x10x192xbf16, #tpu.memory_space<vmem>>, vector<2x2x1x192xbf16>
    tpu.vector_store %arg11[%c0_4, %c0_5, %c9, %c0_6], %2 {strides = array<i32>} : memref<2x2x10x192xbf16, #tpu.memory_space<vmem>>, vector<2x2x1x192xbf16>,
    %cst_7 = arith.constant 0.000000e+00 : bf16
    %4 = vector.broadcast %cst_7 : bf16 to vector<2x2x96xbf16>
    %c0_8 = arith.constant 0 : index
    %c0_9 = arith.constant 0 : index
    %c0_10 = arith.constant 0 : index
    %5 = vector.load %arg12[%c0_8, %c0_9, %c0_10] : memref<2x12x96xbf16, #tpu.memory_space<vmem>>, vector<2x2x96xbf16>
    tpu.vector_store %arg12[%c0_8, %c0_9, %c0_10], %4 {strides = array<i32>} : memref<2x12x96xbf16, #tpu.memory_space<vmem>>, vector<2x2x96xbf16>,
    %cst_11 = arith.constant 0.000000e+00 : bf16
    %6 = vector.broadcast %cst_11 : bf16 to vector<2x2x96xbf16>
    %c0_12 = arith.constant 0 : index
    %c10 = arith.constant 10 : index
    %c0_13 = arith.constant 0 : index
    %7 = vector.load %arg12[%c0_12, %c10, %c0_13] : memref<2x12x96xbf16, #tpu.memory_space<vmem>>, vector<2x2x96xbf16>
    tpu.vector_store %arg12[%c0_12, %c10, %c0_13], %6 {strides = array<i32>} : memref<2x12x96xbf16, #tpu.memory_space<vmem>>, vector<2x2x96xbf16>,
    %c0_14 = arith.constant 0 : index
    %c0_15 = arith.constant 0 : index
    %c0_16 = arith.constant 0 : index
    %c0_17 = arith.constant 0 : index
    %8 = vector.load %arg1[%c0_14, %c0_15, %c0_16, %c0_17] : memref<2x4x9x96xbf16, #tpu.memory_space<vmem>>, vector<2x1x8x96xbf16>
    %9 = vector.shape_cast %8 : vector<2x1x8x96xbf16> to vector<2x8x96xbf16>
    %10 = vector.shape_cast %9 : vector<2x8x96xbf16> to vector<16x96xbf16>
    %c0_18 = arith.constant 0 : index
    %c2 = arith.constant 2 : index
    %c0_19 = arith.constant 0 : index
    %c0_20 = arith.constant 0 : index
    %11 = vector.load %arg1[%c0_18, %c2, %c0_19, %c0_20] : memref<2x4x9x96xbf16, #tpu.memory_space<vmem>>, vector<2x1x8x96xbf16>
    %12 = vector.shape_cast %11 : vector<2x1x8x96xbf16> to vector<2x8x96xbf16>
    %13 = vector.shape_cast %12 : vector<2x8x96xbf16> to vector<16x96xbf16>
    %14 = tpu.concatenate %10, %13 in 0 : vector<16x96xbf16>, vector<16x96xbf16> -> vector<32x96xbf16>
    %c0_21 = arith.constant 0 : index
    %c0_22 = arith.constant 0 : index
    %c0_23 = arith.constant 0 : index
    %15 = vector.load %arg2[%c0_21, %c0_22, %c0_23] : memref<5x96x192xbf16, #tpu.memory_space<vmem>>, vector<1x96x192xbf16>
    %16 = vector.shape_cast %15 : vector<1x96x192xbf16> to vector<96x192xbf16>
    %cst_24 = arith.constant dense<0.000000e+00> : vector<32x192xf32>
    %17 = tpu.matmul %14, %16, %cst_24 {dimension_numbers = #tpu.dot_dimension_numbers<[1], [0], [0], [1], [0, 0, 1, 1], [], []>} : vector<32x96xbf16>, vector<96x192xbf16>, vector<32x192xf32> -> vector<32x192xf32>
    %c0_25 = arith.constant 0 : index
    %c1 = arith.constant 1 : index
    %c0_26 = arith.constant 0 : index
    %c0_27 = arith.constant 0 : index
    %18 = vector.load %arg1[%c0_25, %c1, %c0_26, %c0_27] : memref<2x4x9x96xbf16, #tpu.memory_space<vmem>>, vector<2x1x8x96xbf16>
    %19 = vector.shape_cast %18 : vector<2x1x8x96xbf16> to vector<2x8x96xbf16>
    %20 = vector.shape_cast %19 : vector<2x8x96xbf16> to vector<16x96xbf16>
    %c0_28 = arith.constant 0 : index
    %c3 = arith.constant 3 : index
    %c0_29 = arith.constant 0 : index
    %c0_30 = arith.constant 0 : index
    %21 = vector.load %arg1[%c0_28, %c3, %c0_29, %c0_30] : memref<2x4x9x96xbf16, #tpu.memory_space<vmem>>, vector<2x1x8x96xbf16>
    %22 = vector.shape_cast %21 : vector<2x1x8x96xbf16> to vector<2x8x96xbf16>
    %23 = vector.shape_cast %22 : vector<2x8x96xbf16> to vector<16x96xbf16>
    %24 = tpu.concatenate %20, %23 in 0 : vector<16x96xbf16>, vector<16x96xbf16> -> vector<32x96xbf16>
    %c1_31 = arith.constant 1 : index
    %c0_32 = arith.constant 0 : index
    %c0_33 = arith.constant 0 : index
    %25 = vector.load %arg2[%c1_31, %c0_32, %c0_33] : memref<5x96x192xbf16, #tpu.memory_space<vmem>>, vector<1x96x192xbf16>
    %26 = vector.shape_cast %25 : vector<1x96x192xbf16> to vector<96x192xbf16>
    %cst_34 = arith.constant dense<0.000000e+00> : vector<32x192xf32>
    %27 = tpu.matmul %24, %26, %cst_34 {dimension_numbers = #tpu.dot_dimension_numbers<[1], [0], [0], [1], [0, 0, 1, 1], [], []>} : vector<32x96xbf16>, vector<96x192xbf16>, vector<32x192xf32> -> vector<32x192xf32>
    %28 = arith.addf %17, %27 : vector<32x192xf32>
    %c0_35 = arith.constant 0 : index
    %c2_36 = arith.constant 2 : index
    %c0_37 = arith.constant 0 : index
    %c0_38 = arith.constant 0 : index
    %29 = vector.load %arg1[%c0_35, %c2_36, %c0_37, %c0_38] : memref<2x4x9x96xbf16, #tpu.memory_space<vmem>>, vector<2x1x8x96xbf16>
    %30 = vector.shape_cast %29 : vector<2x1x8x96xbf16> to vector<2x8x96xbf16>
    %31 = vector.shape_cast %30 : vector<2x8x96xbf16> to vector<16x96xbf16>
    %c0_39 = arith.constant 0 : index
    %c0_40 = arith.constant 0 : index
    %c1_41 = arith.constant 1 : index
    %c0_42 = arith.constant 0 : index
    %32 = vector.load %arg1[%c0_39, %c0_40, %c1_41, %c0_42] : memref<2x4x9x96xbf16, #tpu.memory_space<vmem>>, vector<2x1x8x96xbf16>
    %33 = vector.shape_cast %32 : vector<2x1x8x96xbf16> to vector<2x8x96xbf16>
    %34 = vector.shape_cast %33 : vector<2x8x96xbf16> to vector<16x96xbf16>
    %35 = tpu.concatenate %31, %34 in 0 : vector<16x96xbf16>, vector<16x96xbf16> -> vector<32x96xbf16>
    %c2_43 = arith.constant 2 : index
    %c0_44 = arith.constant 0 : index
    %c0_45 = arith.constant 0 : index
    %36 = vector.load %arg2[%c2_43, %c0_44, %c0_45] : memref<5x96x192xbf16, #tpu.memory_space<vmem>>, vector<1x96x192xbf16>
    %37 = vector.shape_cast %36 : vector<1x96x192xbf16> to vector<96x192xbf16>
    %cst_46 = arith.constant dense<0.000000e+00> : vector<32x192xf32>
    %38 = tpu.matmul %35, %37, %cst_46 {dimension_numbers = #tpu.dot_dimension_numbers<[1], [0], [0], [1], [0, 0, 1, 1], [], []>} : vector<32x96xbf16>, vector<96x192xbf16>, vector<32x192xf32> -> vector<32x192xf32>
    %39 = arith.addf %28, %38 : vector<32x192xf32>
    %c0_47 = arith.constant 0 : index
    %c3_48 = arith.constant 3 : index
    %c0_49 = arith.constant 0 : index
    %c0_50 = arith.constant 0 : index
    %40 = vector.load %arg1[%c0_47, %c3_48, %c0_49, %c0_50] : memref<2x4x9x96xbf16, #tpu.memory_space<vmem>>, vector<2x1x8x96xbf16>
    %41 = vector.shape_cast %40 : vector<2x1x8x96xbf16> to vector<2x8x96xbf16>
    %42 = vector.shape_cast %41 : vector<2x8x96xbf16> to vector<16x96xbf16>
    %c0_51 = arith.constant 0 : index
    %c1_52 = arith.constant 1 : index
    %c1_53 = arith.constant 1 : index
    %c0_54 = arith.constant 0 : index
    %43 = vector.load %arg1[%c0_51, %c1_52, %c1_53, %c0_54] : memref<2x4x9x96xbf16, #tpu.memory_space<vmem>>, vector<2x1x8x96xbf16>
    %44 = vector.shape_cast %43 : vector<2x1x8x96xbf16> to vector<2x8x96xbf16>
    %45 = vector.shape_cast %44 : vector<2x8x96xbf16> to vector<16x96xbf16>
    %46 = tpu.concatenate %42, %45 in 0 : vector<16x96xbf16>, vector<16x96xbf16> -> vector<32x96xbf16>
    %c3_55 = arith.constant 3 : index
    %c0_56 = arith.constant 0 : index
    %c0_57 = arith.constant 0 : index
    %47 = vector.load %arg2[%c3_55, %c0_56, %c0_57] : memref<5x96x192xbf16, #tpu.memory_space<vmem>>, vector<1x96x192xbf16>
    %48 = vector.shape_cast %47 : vector<1x96x192xbf16> to vector<96x192xbf16>
    %cst_58 = arith.constant dense<0.000000e+00> : vector<32x192xf32>
    %49 = tpu.matmul %46, %48, %cst_58 {dimension_numbers = #tpu.dot_dimension_numbers<[1], [0], [0], [1], [0, 0, 1, 1], [], []>} : vector<32x96xbf16>, vector<96x192xbf16>, vector<32x192xf32> -> vector<32x192xf32>
    %50 = arith.addf %39, %49 : vector<32x192xf32>
    %c0_59 = arith.constant 0 : index
    %c0_60 = arith.constant 0 : index
    %c1_61 = arith.constant 1 : index
    %c0_62 = arith.constant 0 : index
    %51 = vector.load %arg1[%c0_59, %c0_60, %c1_61, %c0_62] : memref<2x4x9x96xbf16, #tpu.memory_space<vmem>>, vector<2x1x8x96xbf16>
    %52 = vector.shape_cast %51 : vector<2x1x8x96xbf16> to vector<2x8x96xbf16>
    %53 = vector.shape_cast %52 : vector<2x8x96xbf16> to vector<16x96xbf16>
    %c0_63 = arith.constant 0 : index
    %c2_64 = arith.constant 2 : index
    %c1_65 = arith.constant 1 : index
    %c0_66 = arith.constant 0 : index
    %54 = vector.load %arg1[%c0_63, %c2_64, %c1_65, %c0_66] : memref<2x4x9x96xbf16, #tpu.memory_space<vmem>>, vector<2x1x8x96xbf16>
    %55 = vector.shape_cast %54 : vector<2x1x8x96xbf16> to vector<2x8x96xbf16>
    %56 = vector.shape_cast %55 : vector<2x8x96xbf16> to vector<16x96xbf16>
    %57 = tpu.concatenate %53, %56 in 0 : vector<16x96xbf16>, vector<16x96xbf16> -> vector<32x96xbf16>
    %c4 = arith.constant 4 : index
    %c0_67 = arith.constant 0 : index
    %c0_68 = arith.constant 0 : index
    %58 = vector.load %arg2[%c4, %c0_67, %c0_68] : memref<5x96x192xbf16, #tpu.memory_space<vmem>>, vector<1x96x192xbf16>
    %59 = vector.shape_cast %58 : vector<1x96x192xbf16> to vector<96x192xbf16>
    %cst_69 = arith.constant dense<0.000000e+00> : vector<32x192xf32>
    %60 = tpu.matmul %57, %59, %cst_69 {dimension_numbers = #tpu.dot_dimension_numbers<[1], [0], [0], [1], [0, 0, 1, 1], [], []>} : vector<32x96xbf16>, vector<96x192xbf16>, vector<32x192xf32> -> vector<32x192xf32>
    %61 = arith.addf %50, %60 : vector<32x192xf32>
    %c0_70 = arith.constant 0 : index
    %c0_71 = arith.constant 0 : index
    %62 = vector.load %arg3[%c0_70, %c0_71] : memref<1x192xf32, #tpu.memory_space<vmem>>, vector<1x192xf32>
    %63 = vector.broadcast %62 : vector<1x192xf32> to vector<32x192xf32>
    %64 = arith.addf %61, %63 : vector<32x192xf32>
    %65 = arith.negf %64 : vector<32x192xf32>
    %66 = math.exp %65 : vector<32x192xf32>
    %cst_72 = arith.constant 1.000000e+00 : f32
    %67 = vector.broadcast %cst_72 : f32 to vector<32x192xf32>
    %68 = arith.addf %67, %66 : vector<32x192xf32>
    %69 = arith.divf %67, %68 : vector<32x192xf32>
    %70 = arith.truncf %69 : vector<32x192xf32> to vector<32x192xbf16>
    %71 = vector.extract_strided_slice %70 {offsets = [0, 0], sizes = [16, 192], strides = [1, 1]} : vector<32x192xbf16> to vector<16x192xbf16>
    %72 = vector.shape_cast %71 : vector<16x192xbf16> to vector<2x1x8x192xbf16>
    %c0_73 = arith.constant 0 : index
    %c0_74 = arith.constant 0 : index
    %c1_75 = arith.constant 1 : index
    %c0_76 = arith.constant 0 : index
    %73 = vector.load %arg11[%c0_73, %c0_74, %c1_75, %c0_76] : memref<2x2x10x192xbf16, #tpu.memory_space<vmem>>, vector<2x1x8x192xbf16>
    tpu.vector_store %arg11[%c0_73, %c0_74, %c1_75, %c0_76], %72 {strides = array<i32>} : memref<2x2x10x192xbf16, #tpu.memory_space<vmem>>, vector<2x1x8x192xbf16>,
    %74 = vector.extract_strided_slice %70 {offsets = [16, 0], sizes = [16, 192], strides = [1, 1]} : vector<32x192xbf16> to vector<16x192xbf16>
    %75 = vector.shape_cast %74 : vector<16x192xbf16> to vector<2x1x8x192xbf16>
    %c0_77 = arith.constant 0 : index
    %c1_78 = arith.constant 1 : index
    %c1_79 = arith.constant 1 : index
    %c0_80 = arith.constant 0 : index
    %76 = vector.load %arg11[%c0_77, %c1_78, %c1_79, %c0_80] : memref<2x2x10x192xbf16, #tpu.memory_space<vmem>>, vector<2x1x8x192xbf16>
    tpu.vector_store %arg11[%c0_77, %c1_78, %c1_79, %c0_80], %75 {strides = array<i32>} : memref<2x2x10x192xbf16, #tpu.memory_space<vmem>>, vector<2x1x8x192xbf16>,
    %c0_81 = arith.constant 0 : index
    %c0_82 = arith.constant 0 : index
    %c0_83 = arith.constant 0 : index
    %c0_84 = arith.constant 0 : index
    %77 = vector.load %arg11[%c0_81, %c0_82, %c0_83, %c0_84] : memref<2x2x10x192xbf16, #tpu.memory_space<vmem>>, vector<2x1x8x192xbf16>
    %78 = vector.shape_cast %77 : vector<2x1x8x192xbf16> to vector<2x8x192xbf16>
    %79 = vector.shape_cast %78 : vector<2x8x192xbf16> to vector<16x192xbf16>
    %c0_85 = arith.constant 0 : index
    %c0_86 = arith.constant 0 : index
    %c0_87 = arith.constant 0 : index
    %80 = vector.load %arg4[%c0_85, %c0_86, %c0_87] : memref<5x192x96xbf16, #tpu.memory_space<vmem>>, vector<1x192x96xbf16>
    %81 = vector.shape_cast %80 : vector<1x192x96xbf16> to vector<192x96xbf16>
    %cst_88 = arith.constant dense<0.000000e+00> : vector<16x96xf32>
    %82 = tpu.matmul %79, %81, %cst_88 {dimension_numbers = #tpu.dot_dimension_numbers<[1], [0], [0], [1], [0, 0, 1, 1], [], []>} : vector<16x192xbf16>, vector<192x96xbf16>, vector<16x96xf32> -> vector<16x96xf32>
    %c0_89 = arith.constant 0 : index
    %c1_90 = arith.constant 1 : index
    %c0_91 = arith.constant 0 : index
    %c0_92 = arith.constant 0 : index
    %83 = vector.load %arg11[%c0_89, %c1_90, %c0_91, %c0_92] : memref<2x2x10x192xbf16, #tpu.memory_space<vmem>>, vector<2x1x8x192xbf16>
    %84 = vector.shape_cast %83 : vector<2x1x8x192xbf16> to vector<2x8x192xbf16>
    %85 = vector.shape_cast %84 : vector<2x8x192xbf16> to vector<16x192xbf16>
    %c1_93 = arith.constant 1 : index
    %c0_94 = arith.constant 0 : index
    %c0_95 = arith.constant 0 : index
    %86 = vector.load %arg4[%c1_93, %c0_94, %c0_95] : memref<5x192x96xbf16, #tpu.memory_space<vmem>>, vector<1x192x96xbf16>
    %87 = vector.shape_cast %86 : vector<1x192x96xbf16> to vector<192x96xbf16>
    %cst_96 = arith.constant dense<0.000000e+00> : vector<16x96xf32>
    %88 = tpu.matmul %85, %87, %cst_96 {dimension_numbers = #tpu.dot_dimension_numbers<[1], [0], [0], [1], [0, 0, 1, 1], [], []>} : vector<16x192xbf16>, vector<192x96xbf16>, vector<16x96xf32> -> vector<16x96xf32>
    %89 = arith.addf %82, %88 : vector<16x96xf32>
    %c0_97 = arith.constant 0 : index
    %c0_98 = arith.constant 0 : index
    %c1_99 = arith.constant 1 : index
    %c0_100 = arith.constant 0 : index
    %90 = vector.load %arg11[%c0_97, %c0_98, %c1_99, %c0_100] : memref<2x2x10x192xbf16, #tpu.memory_space<vmem>>, vector<2x1x8x192xbf16>
    %91 = vector.shape_cast %90 : vector<2x1x8x192xbf16> to vector<2x8x192xbf16>
    %92 = vector.shape_cast %91 : vector<2x8x192xbf16> to vector<16x192xbf16>
    %c2_101 = arith.constant 2 : index
    %c0_102 = arith.constant 0 : index
    %c0_103 = arith.constant 0 : index
    %93 = vector.load %arg4[%c2_101, %c0_102, %c0_103] : memref<5x192x96xbf16, #tpu.memory_space<vmem>>, vector<1x192x96xbf16>
    %94 = vector.shape_cast %93 : vector<1x192x96xbf16> to vector<192x96xbf16>
    %cst_104 = arith.constant dense<0.000000e+00> : vector<16x96xf32>
    %95 = tpu.matmul %92, %94, %cst_104 {dimension_numbers = #tpu.dot_dimension_numbers<[1], [0], [0], [1], [0, 0, 1, 1], [], []>} : vector<16x192xbf16>, vector<192x96xbf16>, vector<16x96xf32> -> vector<16x96xf32>
    %96 = arith.addf %89, %95 : vector<16x96xf32>
    %c0_105 = arith.constant 0 : index
    %c1_106 = arith.constant 1 : index
    %c1_107 = arith.constant 1 : index
    %c0_108 = arith.constant 0 : index
    %97 = vector.load %arg11[%c0_105, %c1_106, %c1_107, %c0_108] : memref<2x2x10x192xbf16, #tpu.memory_space<vmem>>, vector<2x1x8x192xbf16>
    %98 = vector.shape_cast %97 : vector<2x1x8x192xbf16> to vector<2x8x192xbf16>
    %99 = vector.shape_cast %98 : vector<2x8x192xbf16> to vector<16x192xbf16>
    %c3_109 = arith.constant 3 : index
    %c0_110 = arith.constant 0 : index
    %c0_111 = arith.constant 0 : index
    %100 = vector.load %arg4[%c3_109, %c0_110, %c0_111] : memref<5x192x96xbf16, #tpu.memory_space<vmem>>, vector<1x192x96xbf16>
    %101 = vector.shape_cast %100 : vector<1x192x96xbf16> to vector<192x96xbf16>
    %cst_112 = arith.constant dense<0.000000e+00> : vector<16x96xf32>
    %102 = tpu.matmul %99, %101, %cst_112 {dimension_numbers = #tpu.dot_dimension_numbers<[1], [0], [0], [1], [0, 0, 1, 1], [], []>} : vector<16x192xbf16>, vector<192x96xbf16>, vector<16x96xf32> -> vector<16x96xf32>
    %103 = arith.addf %96, %102 : vector<16x96xf32>
    %c0_113 = arith.constant 0 : index
    %c0_114 = arith.constant 0 : index
    %c2_115 = arith.constant 2 : index
    %c0_116 = arith.constant 0 : index
    %104 = vector.load %arg11[%c0_113, %c0_114, %c2_115, %c0_116] : memref<2x2x10x192xbf16, #tpu.memory_space<vmem>>, vector<2x1x8x192xbf16>
    %105 = vector.shape_cast %104 : vector<2x1x8x192xbf16> to vector<2x8x192xbf16>
    %106 = vector.shape_cast %105 : vector<2x8x192xbf16> to vector<16x192xbf16>
    %c4_117 = arith.constant 4 : index
    %c0_118 = arith.constant 0 : index
    %c0_119 = arith.constant 0 : index
    %107 = vector.load %arg4[%c4_117, %c0_118, %c0_119] : memref<5x192x96xbf16, #tpu.memory_space<vmem>>, vector<1x192x96xbf16>
    %108 = vector.shape_cast %107 : vector<1x192x96xbf16> to vector<192x96xbf16>
    %cst_120 = arith.constant dense<0.000000e+00> : vector<16x96xf32>
    %109 = tpu.matmul %106, %108, %cst_120 {dimension_numbers = #tpu.dot_dimension_numbers<[1], [0], [0], [1], [0, 0, 1, 1], [], []>} : vector<16x192xbf16>, vector<192x96xbf16>, vector<16x96xf32> -> vector<16x96xf32>
    %110 = arith.addf %103, %109 : vector<16x96xf32>
    %c0_121 = arith.constant 0 : index
    %c0_122 = arith.constant 0 : index
    %111 = vector.load %arg5[%c0_121, %c0_122] : memref<1x96xf32, #tpu.memory_space<vmem>>, vector<1x96xf32>
    %112 = vector.broadcast %111 : vector<1x96xf32> to vector<16x96xf32>
    %113 = arith.addf %110, %112 : vector<16x96xf32>
    %114 = arith.negf %113 : vector<16x96xf32>
    %115 = math.exp %114 : vector<16x96xf32>
    %cst_123 = arith.constant 1.000000e+00 : f32
    %116 = vector.broadcast %cst_123 : f32 to vector<16x96xf32>
    %117 = arith.addf %116, %115 : vector<16x96xf32>
    %118 = arith.divf %116, %117 : vector<16x96xf32>
    %119 = arith.truncf %118 : vector<16x96xf32> to vector<16x96xbf16>
    %120 = vector.shape_cast %119 : vector<16x96xbf16> to vector<2x8x96xbf16>
    %c0_124 = arith.constant 0 : index
    %c2_125 = arith.constant 2 : index
    %c0_126 = arith.constant 0 : index
    %121 = vector.load %arg12[%c0_124, %c2_125, %c0_126] : memref<2x12x96xbf16, #tpu.memory_space<vmem>>, vector<2x8x96xbf16>
    tpu.vector_store %arg12[%c0_124, %c2_125, %c0_126], %120 {strides = array<i32>} : memref<2x12x96xbf16, #tpu.memory_space<vmem>>, vector<2x8x96xbf16>,
    %c0_127 = arith.constant 0 : index
    %c0_128 = arith.constant 0 : index
    %c0_129 = arith.constant 0 : index
    %122 = vector.load %arg12[%c0_127, %c0_128, %c0_129] : memref<2x12x96xbf16, #tpu.memory_space<vmem>>, vector<2x8x96xbf16>
    %123 = vector.shape_cast %122 : vector<2x8x96xbf16> to vector<16x96xbf16>
    %c0_130 = arith.constant 0 : index
    %c0_131 = arith.constant 0 : index
    %c0_132 = arith.constant 0 : index
    %124 = vector.load %arg6[%c0_130, %c0_131, %c0_132] : memref<5x96x128xbf16, #tpu.memory_space<vmem>>, vector<1x96x128xbf16>
    %125 = vector.shape_cast %124 : vector<1x96x128xbf16> to vector<96x128xbf16>
    %cst_133 = arith.constant dense<0.000000e+00> : vector<16x128xf32>
    %126 = tpu.matmul %123, %125, %cst_133 {dimension_numbers = #tpu.dot_dimension_numbers<[1], [0], [0], [1], [0, 0, 1, 1], [], []>} : vector<16x96xbf16>, vector<96x128xbf16>, vector<16x128xf32> -> vector<16x128xf32>
    %c0_134 = arith.constant 0 : index
    %c1_135 = arith.constant 1 : index
    %c0_136 = arith.constant 0 : index
    %127 = vector.load %arg12[%c0_134, %c1_135, %c0_136] : memref<2x12x96xbf16, #tpu.memory_space<vmem>>, vector<2x8x96xbf16>
    %128 = vector.shape_cast %127 : vector<2x8x96xbf16> to vector<16x96xbf16>
    %c1_137 = arith.constant 1 : index
    %c0_138 = arith.constant 0 : index
    %c0_139 = arith.constant 0 : index
    %129 = vector.load %arg6[%c1_137, %c0_138, %c0_139] : memref<5x96x128xbf16, #tpu.memory_space<vmem>>, vector<1x96x128xbf16>
    %130 = vector.shape_cast %129 : vector<1x96x128xbf16> to vector<96x128xbf16>
    %cst_140 = arith.constant dense<0.000000e+00> : vector<16x128xf32>
    %131 = tpu.matmul %128, %130, %cst_140 {dimension_numbers = #tpu.dot_dimension_numbers<[1], [0], [0], [1], [0, 0, 1, 1], [], []>} : vector<16x96xbf16>, vector<96x128xbf16>, vector<16x128xf32> -> vector<16x128xf32>
    %132 = arith.addf %126, %131 : vector<16x128xf32>
    %c0_141 = arith.constant 0 : index
    %c2_142 = arith.constant 2 : index
    %c0_143 = arith.constant 0 : index
    %133 = vector.load %arg12[%c0_141, %c2_142, %c0_143] : memref<2x12x96xbf16, #tpu.memory_space<vmem>>, vector<2x8x96xbf16>
    %134 = vector.shape_cast %133 : vector<2x8x96xbf16> to vector<16x96xbf16>
    %c2_144 = arith.constant 2 : index
    %c0_145 = arith.constant 0 : index
    %c0_146 = arith.constant 0 : index
    %135 = vector.load %arg6[%c2_144, %c0_145, %c0_146] : memref<5x96x128xbf16, #tpu.memory_space<vmem>>, vector<1x96x128xbf16>
    %136 = vector.shape_cast %135 : vector<1x96x128xbf16> to vector<96x128xbf16>
    %cst_147 = arith.constant dense<0.000000e+00> : vector<16x128xf32>
    %137 = tpu.matmul %134, %136, %cst_147 {dimension_numbers = #tpu.dot_dimension_numbers<[1], [0], [0], [1], [0, 0, 1, 1], [], []>} : vector<16x96xbf16>, vector<96x128xbf16>, vector<16x128xf32> -> vector<16x128xf32>
    %138 = arith.addf %132, %137 : vector<16x128xf32>
    %c0_148 = arith.constant 0 : index
    %c3_149 = arith.constant 3 : index
    %c0_150 = arith.constant 0 : index
    %139 = vector.load %arg12[%c0_148, %c3_149, %c0_150] : memref<2x12x96xbf16, #tpu.memory_space<vmem>>, vector<2x8x96xbf16>
    %140 = vector.shape_cast %139 : vector<2x8x96xbf16> to vector<16x96xbf16>
    %c3_151 = arith.constant 3 : index
    %c0_152 = arith.constant 0 : index
    %c0_153 = arith.constant 0 : index
    %141 = vector.load %arg6[%c3_151, %c0_152, %c0_153] : memref<5x96x128xbf16, #tpu.memory_space<vmem>>, vector<1x96x128xbf16>
    %142 = vector.shape_cast %141 : vector<1x96x128xbf16> to vector<96x128xbf16>
    %cst_154 = arith.constant dense<0.000000e+00> : vector<16x128xf32>
    %143 = tpu.matmul %140, %142, %cst_154 {dimension_numbers = #tpu.dot_dimension_numbers<[1], [0], [0], [1], [0, 0, 1, 1], [], []>} : vector<16x96xbf16>, vector<96x128xbf16>, vector<16x128xf32> -> vector<16x128xf32>
    %144 = arith.addf %138, %143 : vector<16x128xf32>
    %c0_155 = arith.constant 0 : index
    %c4_156 = arith.constant 4 : index
    %c0_157 = arith.constant 0 : index
    %145 = vector.load %arg12[%c0_155, %c4_156, %c0_157] : memref<2x12x96xbf16, #tpu.memory_space<vmem>>, vector<2x8x96xbf16>
    %146 = vector.shape_cast %145 : vector<2x8x96xbf16> to vector<16x96xbf16>
    %c4_158 = arith.constant 4 : index
    %c0_159 = arith.constant 0 : index
    %c0_160 = arith.constant 0 : index
    %147 = vector.load %arg6[%c4_158, %c0_159, %c0_160] : memref<5x96x128xbf16, #tpu.memory_space<vmem>>, vector<1x96x128xbf16>
    %148 = vector.shape_cast %147 : vector<1x96x128xbf16> to vector<96x128xbf16>
    %cst_161 = arith.constant dense<0.000000e+00> : vector<16x128xf32>
    %149 = tpu.matmul %146, %148, %cst_161 {dimension_numbers = #tpu.dot_dimension_numbers<[1], [0], [0], [1], [0, 0, 1, 1], [], []>} : vector<16x96xbf16>, vector<96x128xbf16>, vector<16x128xf32> -> vector<16x128xf32>
    %150 = arith.addf %144, %149 : vector<16x128xf32>
    %c0_162 = arith.constant 0 : index
    %c0_163 = arith.constant 0 : index
    %151 = vector.load %arg7[%c0_162, %c0_163] : memref<1x128xf32, #tpu.memory_space<vmem>>, vector<1x128xf32>
    %152 = vector.broadcast %151 : vector<1x128xf32> to vector<16x128xf32>
    %153 = arith.addf %150, %152 : vector<16x128xf32>
    %154 = arith.negf %153 : vector<16x128xf32>
    %155 = math.exp %154 : vector<16x128xf32>
    %cst_164 = arith.constant 1.000000e+00 : f32
    %156 = vector.broadcast %cst_164 : f32 to vector<16x128xf32>
    %157 = arith.addf %156, %155 : vector<16x128xf32>
    %158 = arith.divf %156, %157 : vector<16x128xf32>
    %159 = arith.truncf %158 : vector<16x128xf32> to vector<16x128xbf16>
    %160 = vector.shape_cast %159 : vector<16x128xbf16> to vector<2x8x128xbf16>
    %161 = vector.extract_strided_slice %160 {offsets = [0, 0, 0], sizes = [2, 1, 128], strides = [1, 1, 1]} : vector<2x8x128xbf16> to vector<2x1x128xbf16>
    %162 = vector.shape_cast %161 : vector<2x1x128xbf16> to vector<2x128xbf16>
    %c0_165 = arith.constant 0 : index
    %c0_166 = arith.constant 0 : index
    %163 = vector.load %arg13[%c0_165, %c0_166] : memref<2x1024xbf16, #tpu.memory_space<vmem>>, vector<2x128xbf16>
    tpu.vector_store %arg13[%c0_165, %c0_166], %162 {strides = array<i32>} : memref<2x1024xbf16, #tpu.memory_space<vmem>>, vector<2x128xbf16>,
    %164 = vector.extract_strided_slice %160 {offsets = [0, 1, 0], sizes = [2, 1, 128], strides = [1, 1, 1]} : vector<2x8x128xbf16> to vector<2x1x128xbf16>
    %165 = vector.shape_cast %164 : vector<2x1x128xbf16> to vector<2x128xbf16>
    %c0_167 = arith.constant 0 : index
    %c128 = arith.constant 128 : index
    %166 = vector.load %arg13[%c0_167, %c128] : memref<2x1024xbf16, #tpu.memory_space<vmem>>, vector<2x128xbf16>
    tpu.vector_store %arg13[%c0_167, %c128], %165 {strides = array<i32>} : memref<2x1024xbf16, #tpu.memory_space<vmem>>, vector<2x128xbf16>,
    %167 = vector.extract_strided_slice %160 {offsets = [0, 2, 0], sizes = [2, 1, 128], strides = [1, 1, 1]} : vector<2x8x128xbf16> to vector<2x1x128xbf16>
    %168 = vector.shape_cast %167 : vector<2x1x128xbf16> to vector<2x128xbf16>
    %c0_168 = arith.constant 0 : index
    %c256 = arith.constant 256 : index
    %169 = vector.load %arg13[%c0_168, %c256] : memref<2x1024xbf16, #tpu.memory_space<vmem>>, vector<2x128xbf16>
    tpu.vector_store %arg13[%c0_168, %c256], %168 {strides = array<i32>} : memref<2x1024xbf16, #tpu.memory_space<vmem>>, vector<2x128xbf16>,
    %170 = vector.extract_strided_slice %160 {offsets = [0, 3, 0], sizes = [2, 1, 128], strides = [1, 1, 1]} : vector<2x8x128xbf16> to vector<2x1x128xbf16>
    %171 = vector.shape_cast %170 : vector<2x1x128xbf16> to vector<2x128xbf16>
    %c0_169 = arith.constant 0 : index
    %c384 = arith.constant 384 : index
    %172 = vector.load %arg13[%c0_169, %c384] : memref<2x1024xbf16, #tpu.memory_space<vmem>>, vector<2x128xbf16>
    tpu.vector_store %arg13[%c0_169, %c384], %171 {strides = array<i32>} : memref<2x1024xbf16, #tpu.memory_space<vmem>>, vector<2x128xbf16>,
    %173 = vector.extract_strided_slice %160 {offsets = [0, 4, 0], sizes = [2, 1, 128], strides = [1, 1, 1]} : vector<2x8x128xbf16> to vector<2x1x128xbf16>
    %174 = vector.shape_cast %173 : vector<2x1x128xbf16> to vector<2x128xbf16>
    %c0_170 = arith.constant 0 : index
    %c512 = arith.constant 512 : index
    %175 = vector.load %arg13[%c0_170, %c512] : memref<2x1024xbf16, #tpu.memory_space<vmem>>, vector<2x128xbf16>
    tpu.vector_store %arg13[%c0_170, %c512], %174 {strides = array<i32>} : memref<2x1024xbf16, #tpu.memory_space<vmem>>, vector<2x128xbf16>,
    %176 = vector.extract_strided_slice %160 {offsets = [0, 5, 0], sizes = [2, 1, 128], strides = [1, 1, 1]} : vector<2x8x128xbf16> to vector<2x1x128xbf16>
    %177 = vector.shape_cast %176 : vector<2x1x128xbf16> to vector<2x128xbf16>
    %c0_171 = arith.constant 0 : index
    %c640 = arith.constant 640 : index
    %178 = vector.load %arg13[%c0_171, %c640] : memref<2x1024xbf16, #tpu.memory_space<vmem>>, vector<2x128xbf16>
    tpu.vector_store %arg13[%c0_171, %c640], %177 {strides = array<i32>} : memref<2x1024xbf16, #tpu.memory_space<vmem>>, vector<2x128xbf16>,
    %179 = vector.extract_strided_slice %160 {offsets = [0, 6, 0], sizes = [2, 1, 128], strides = [1, 1, 1]} : vector<2x8x128xbf16> to vector<2x1x128xbf16>
    %180 = vector.shape_cast %179 : vector<2x1x128xbf16> to vector<2x128xbf16>
    %c0_172 = arith.constant 0 : index
    %c768 = arith.constant 768 : index
    %181 = vector.load %arg13[%c0_172, %c768] : memref<2x1024xbf16, #tpu.memory_space<vmem>>, vector<2x128xbf16>
    tpu.vector_store %arg13[%c0_172, %c768], %180 {strides = array<i32>} : memref<2x1024xbf16, #tpu.memory_space<vmem>>, vector<2x128xbf16>,
    %182 = vector.extract_strided_slice %160 {offsets = [0, 7, 0], sizes = [2, 1, 128], strides = [1, 1, 1]} : vector<2x8x128xbf16> to vector<2x1x128xbf16>
    %183 = vector.shape_cast %182 : vector<2x1x128xbf16> to vector<2x128xbf16>
    %c0_173 = arith.constant 0 : index
    %c896 = arith.constant 896 : index
    %184 = vector.load %arg13[%c0_173, %c896] : memref<2x1024xbf16, #tpu.memory_space<vmem>>, vector<2x128xbf16>
    tpu.vector_store %arg13[%c0_173, %c896], %183 {strides = array<i32>} : memref<2x1024xbf16, #tpu.memory_space<vmem>>, vector<2x128xbf16>,
    %c0_174 = arith.constant 0 : index
    %c0_175 = arith.constant 0 : index
    %185 = vector.load %arg13[%c0_174, %c0_175] : memref<2x1024xbf16, #tpu.memory_space<vmem>>, vector<2x1024xbf16>
    %c0_176 = arith.constant 0 : index
    %c0_177 = arith.constant 0 : index
    %186 = vector.load %arg8[%c0_176, %c0_177] : memref<1024x128xbf16, #tpu.memory_space<vmem>>, vector<1024x128xbf16>
    %cst_178 = arith.constant dense<0.000000e+00> : vector<2x128xf32>
    %187 = tpu.matmul %185, %186, %cst_178 {dimension_numbers = #tpu.dot_dimension_numbers<[1], [0], [0], [1], [0, 0, 1, 1], [], []>} : vector<2x1024xbf16>, vector<1024x128xbf16>, vector<2x128xf32> -> vector<2x128xf32>
    %c0_179 = arith.constant 0 : index
    %c0_180 = arith.constant 0 : index
    %188 = vector.load %arg9[%c0_179, %c0_180] : memref<1x128xf32, #tpu.memory_space<vmem>>, vector<1x128xf32>
    %189 = vector.broadcast %188 : vector<1x128xf32> to vector<2x128xf32>
    %190 = arith.addf %187, %189 : vector<2x128xf32>
    %c0_181 = arith.constant 0 : index
    %c0_182 = arith.constant 0 : index
    %191 = vector.load %arg10[%c0_181, %c0_182] : memref<2x128xf32, #tpu.memory_space<vmem>>, vector<2x128xf32>
    tpu.vector_store %arg10[%c0_181, %c0_182], %190 {strides = array<i32>} : memref<2x128xf32, #tpu.memory_space<vmem>>, vector<2x128xf32>,
    return
  }
  func.func @transform_0(%arg0: i32) -> (i32, i32, i32, i32) {
    %c0_i32 = arith.constant 0 : i32
    %c0_i32_0 = arith.constant 0 : i32
    %c0_i32_1 = arith.constant 0 : i32
    %c0_i32_2 = arith.constant 0 : i32
    return %arg0, %c0_i32, %c0_i32_0, %c0_i32_1 : i32, i32, i32, i32
  }
  func.func @transform_1(%arg0: i32) -> (i32, i32, i32) {
    %c0_i32 = arith.constant 0 : i32
    %c0_i32_0 = arith.constant 0 : i32
    %c0_i32_1 = arith.constant 0 : i32
    %c0_i32_2 = arith.constant 0 : i32
    return %c0_i32, %c0_i32_0, %c0_i32_1 : i32, i32, i32
  }
  func.func @transform_2(%arg0: i32) -> (i32, i32) {
    %c0_i32 = arith.constant 0 : i32
    %c0_i32_0 = arith.constant 0 : i32
    %c0_i32_1 = arith.constant 0 : i32
    return %c0_i32, %c0_i32_0 : i32, i32
  }
  func.func @transform_3(%arg0: i32) -> (i32, i32, i32) {
    %c0_i32 = arith.constant 0 : i32
    %c0_i32_0 = arith.constant 0 : i32
    %c0_i32_1 = arith.constant 0 : i32
    %c0_i32_2 = arith.constant 0 : i32
    return %c0_i32, %c0_i32_0, %c0_i32_1 : i32, i32, i32
  }
  func.func @transform_4(%arg0: i32) -> (i32, i32) {
    %c0_i32 = arith.constant 0 : i32
    %c0_i32_0 = arith.constant 0 : i32
    %c0_i32_1 = arith.constant 0 : i32
    return %c0_i32, %c0_i32_0 : i32, i32
  }
  func.func @transform_5(%arg0: i32) -> (i32, i32, i32) {
    %c0_i32 = arith.constant 0 : i32
    %c0_i32_0 = arith.constant 0 : i32
    %c0_i32_1 = arith.constant 0 : i32
    %c0_i32_2 = arith.constant 0 : i32
    return %c0_i32, %c0_i32_0, %c0_i32_1 : i32, i32, i32
  }
  func.func @transform_6(%arg0: i32) -> (i32, i32) {
    %c0_i32 = arith.constant 0 : i32
    %c0_i32_0 = arith.constant 0 : i32
    %c0_i32_1 = arith.constant 0 : i32
    return %c0_i32, %c0_i32_0 : i32, i32
  }
  func.func @transform_7(%arg0: i32) -> (i32, i32) {
    %c0_i32 = arith.constant 0 : i32
    %c0_i32_0 = arith.constant 0 : i32
    %c0_i32_1 = arith.constant 0 : i32
    return %c0_i32, %c0_i32_0 : i32, i32
  }
  func.func @transform_8(%arg0: i32) -> (i32, i32) {
    %c0_i32 = arith.constant 0 : i32
    %c0_i32_0 = arith.constant 0 : i32
    %c0_i32_1 = arith.constant 0 : i32
    return %c0_i32, %c0_i32_0 : i32, i32
  }
  func.func @transform_9(%arg0: i32) -> (i32, i32) {
    %c0_i32 = arith.constant 0 : i32
    %c0_i32_0 = arith.constant 0 : i32
    return %arg0, %c0_i32 : i32, i32
  }
}

</mosaic_0001>

<bundles_post_ra>
// kernel: lenet_forward_pallas.1
= control target key start
LH: loop header
LB: loop body
LE: loop exit
PB: predicated region body
PF: predicated region fallthrough
CT: control target
= control target key end

     0   :  { %14 = vsyncpa [#allocation6], 0  ;;  %s5423_s0 = inlined_call_operand.vmem [shape: bf16[2,4,9,96], index: 0, kind: input, shape index: {}]   ;;  %s5424_s1 = inlined_call_operand.hbm [shape: bf16[5,96,192], index: 1, kind: input, shape index: {}]   ;;  %s5425_s2 = inlined_call_operand.vmem [shape: f32[1,192], index: 2, kind: input, shape index: {}]   ;;  %s5426_s3 = inlined_call_operand.hbm [shape: bf16[5,192,96], index: 3, kind: input, shape index: {}]   ;;  %s5427_s4 = inlined_call_operand.vmem [shape: f32[1,96], index: 4, kind: input, shape index: {}]   ;;  %s5428_s5 = inlined_call_operand.vmem [shape: bf16[5,96,128], index: 5, kind: input, shape index: {}]   ;;  %s5429_s6 = inlined_call_operand.vmem [shape: f32[1,128], index: 6, kind: input, shape index: {}]   ;;  %s5430_s7 = inlined_call_operand.vmem [shape: bf16[1024,128], index: 7, kind: input, shape index: {}]   ;;  %s5431_s8 = inlined_call_operand.vmem [shape: f32[1,128], index: 8, kind: input, shape index: {}]   ;;  %s5432_s9 = inlined_call_operand.hbm [shape: f32[2,128], index: 9, kind: output, shape index: {}]  }
   0x1   :  { %15 = vsyncpa [#allocation9], 0 }
   0x2   :  { %16 = vsyncpa [#allocation7], 0  ;;  %s4620_s30 = smov [#allocation5]   ;;  %s4548_s13 = scalar_lea.hbm %s5424_s1, 7680 }
   0x3   :  { %s24_s10 = sshll.u32 %s4620_s30, 4  ;;  %p4549_p0 = scmp.ne.s32.totalorder %s5424_s1, %s4548_s13  ;;  %s25_s10 = int_to_ptr.vmem [resolvable:$true] %s24_s10 }
   0x4   :  { %p4552_p1 = scmp.lt.u32.totalorder %s4548_s13, %s5424_s1 }
   0x6   :  { %p4554_p2 = pnand %p4552_p1, %p4549_p0 }
   0x8   :  { %4557 = shalt.err (!%p4554_p2)
}
   0x9   :  { %s4558_s18 = scalar_lea.vmem %s25_s10, 7680  ;;  %p4563_p4 = scmp.lt.s32.totalorder %s25_s10, %s25_s10 }
   0xa   :  { %p4559_p3 = scmp.ne.s32.totalorder %s25_s10, %s4558_s18  ;;  %p4564_p5 = scmp.lt.s32.totalorder %s4558_s18, %s4558_s18 }
   0xc   :  { %p4565_p6 = por %p4564_p5, %p4563_p4 }
   0xe   :  { %p4566_p7 = pnand %p4565_p6, %p4559_p3 }
  0x10   :  { %4569 = shalt.err (!%p4566_p7)
}
  0x11   :  { %s4621_s19 = smov 128   ;;  %s4622_s20 = smov 8  }
  0x12   :  { %30 = dma.hbm_to_vmem [thread:$0]  %s5424_s1, 7680, %s25_s10, [#allocation6], %s4621_s19, %s4621_s19, %s4622_s20  }
  0x13   :  { %s4623_s23 = smov [#allocation8]   ;;  %s4570_s27 = scalar_lea.hbm %s5426_s3, 7680 }
  0x14   :  { %s38_s24 = sshll.u32 %s4623_s23, 4  ;;  %p4571_p8 = scmp.ne.s32.totalorder %s5426_s3, %s4570_s27  ;;  %s39_s24 = int_to_ptr.vmem [resolvable:$true] %s38_s24 }
  0x15   :  { %p4574_p9 = scmp.lt.u32.totalorder %s4570_s27, %s5426_s3 }
  0x17   :  { %p4576_p10 = pnand %p4574_p9, %p4571_p8 }
  0x19   :  { %4579 = shalt.err (!%p4576_p10)
}
  0x1a   :  { %s4580_s12 = scalar_lea.vmem %s39_s24, 7680  ;;  %p4585_p12 = scmp.lt.s32.totalorder %s39_s24, %s39_s24 }
  0x1b   :  { %p4581_p11 = scmp.ne.s32.totalorder %s39_s24, %s4580_s12  ;;  %p4586_p13 = scmp.lt.s32.totalorder %s4580_s12, %s4580_s12 }
  0x1d   :  { %p4587_p0 = por %p4586_p13, %p4585_p12 }
  0x1f   :  { %p4588_p1 = pnand %p4587_p0, %p4581_p11 }
  0x21   :  { %4591 = shalt.err (!%p4588_p1)
}
  0x22   :  { %s4624_s1 = smov 64   ;;  %s4625_s10 = smov 4  }
  0x23   :  { %44 = dma.hbm_to_vmem [thread:$0]  %s5426_s3, 7680, %s39_s24, [#allocation9], %s4624_s1, %s4624_s1, %s4625_s10  }
  0x24   :  { %4614 = dma.done.wait [#allocation6], 7680  }
  0x25   :  { %4615 = vsyncadd [#allocation6], 4294959616 }
  0x26   :  { %4616 = dma.done.wait [#allocation9], 7680  }
  0x27   :  { %4617 = vsyncadd [#allocation9], 4294959616  ;;  %v4626_v0 = vmov 0   ;;  %v4255_v1 = vld [vmem:[#allocation5 + $0x64] ss:$8 sps:$4 sm:$0xff]   ;;  %vm220_vm0 = vcmask 785408  }
  0x28   :  { %259 = vmatprep.mubr.bf16.mxu0 %v4626_v0  ;;  %1214 = vmatprep.subr.bf16.mxu1 %v4626_v0  ;;  %v4257_v2 = vld [vmem:[#allocation5 + $0x60] ss:$8 sps:$4 sm:$0xff]   ;;  %v4258_v3 = vld [vmem:[#allocation5 + $0x74] ss:$8 sps:$4 sm:$0xff]   ;;  %v4260_v4 = vld [vmem:[#allocation5 + $0x70] ss:$8 sps:$4 sm:$0xff]  }
  0x29   :  { %227 = vmatprep.subr.bf16.mxu0 %v4255_v1  ;;  %v4261_v5 = vld [vmem:[#allocation5 + $0x84] ss:$8 sps:$4 sm:$0xff]   ;;  %v4263_v6 = vld [vmem:[#allocation5 + $0x80] ss:$8 sps:$4 sm:$0xff]   ;;  %v4264_v7 = vld [vmem:[#allocation5 + $0x94] ss:$8 sps:$4 sm:$0xff]  }
  0x2a   :  { %228 = vmatpush1.bf16.msra.mxu0 %v4257_v2  ;;  %v4266_v8 = vld [vmem:[#allocation5 + $0x90] ss:$8 sps:$4 sm:$0xff]   ;;  %v4267_v9 = vld [vmem:[#allocation5 + $0xa4] ss:$8 sps:$4 sm:$0xff]   ;;  %v4269_v10 = vld [vmem:[#allocation5 + $0xa0] ss:$8 sps:$4 sm:$0xff]  }
  0x2b   :  { %229 = vmatprep.subr.bf16.mxu0 %v4258_v3  ;;  %v4270_v11 = vld [vmem:[#allocation5 + $0xb4] ss:$8 sps:$4 sm:$0xff]   ;;  %v4272_v12 = vld [vmem:[#allocation5 + $0xb0] ss:$8 sps:$4 sm:$0xff]   ;;  %v4275_v15 = vld [vmem:[#allocation5 + $0x4] ss:$8 sps:$4 sm:$0xff]  }
  0x2c   :  { %v3649_v13 = vld [vmem:[%s5423_s0 + $0x8] sm:$0xf]  ;;  %v4273_v17 = vld [vmem:[#allocation5] ss:$8 sps:$4 sm:$0xff]   ;;  %v4278_v18 = vld [vmem:[#allocation5 + $0x14] ss:$8 sps:$4 sm:$0xff]  }
  0x2d   :  { %v3650_v14 = vld [vmem:[%s5423_s0 + $0x28] sm:$0xf]  ;;  %v3651_v20 = vld [vmem:[%s5423_s0 + $0x18] sm:$0xf]  ;;  %v4281_v22 = vld [vmem:[#allocation5 + $0x24] ss:$8 sps:$4 sm:$0xff]  }
  0x2e   :  { %230 = vmatpush1.bf16.msra.mxu0 %v4260_v4  ;;  %v3653_v16 = vcombine.low %v3649_v13, %v3650_v14  ;;  %v4276_v19 = vld [vmem:[#allocation5 + $0x10] ss:$8 sps:$4 sm:$0xff]   ;;  %v3652_v21 = vld [vmem:[%s5423_s0 + $0x38] sm:$0xf]  ;;  %v4284_v25 = vld [vmem:[#allocation5 + $0x34] ss:$8 sps:$4 sm:$0xff]  }
  0x2f   :  { %231 = vmatprep.subr.bf16.mxu0 %v4261_v5  ;;  %v4722_v23 = vcombine.low %v3651_v20, %v3652_v21  ;;  %v4279_v24 = vld [vmem:[#allocation5 + $0x20] ss:$8 sps:$4 sm:$0xff]   ;;  %v4282_v26 = vld [vmem:[#allocation5 + $0x30] ss:$8 sps:$4 sm:$0xff]   ;;  %v4287_v29 = vld [vmem:[#allocation5 + $0x44] ss:$8 sps:$4 sm:$0xff]  }
  0x30   :  { %v399_v27 = vld [vmem:[%s5423_s0] sm:$0xf]  ;;  %v4290_v35 = vld [vmem:[#allocation5 + $0x54] ss:$8 sps:$4 sm:$0xff]   ;;  %v400_v36 = vld [vmem:[%s5423_s0 + $0x4] sm:$0x1] }
  0x31   :  { %v401_v28 = vld [vmem:[%s5423_s0 + $0x20] sm:$0xf]  ;;  %v407_v31 = vshrl.u32 %v399_v27, 16  ;;  %v410_v32 = vshll.u32 %v399_v27, 16  ;;  %v402_v38 = vld [vmem:[%s5423_s0 + $0x24] sm:$0x1] }
  0x32   :  { %232 = vmatpush1.bf16.msra.mxu0 %v4263_v6  ;;  %v4285_v30 = vld [vmem:[#allocation5 + $0x40] ss:$8 sps:$4 sm:$0xff]   ;;  %v421_v33 = vshrl.u32 %v401_v28, 16  ;;  %v424_v34 = vshll.u32 %v401_v28, 16  ;;  %v4288_v39 = vld [vmem:[#allocation5 + $0x50] ss:$8 sps:$4 sm:$0xff]  }
  0x33   :  { %233 = vmatprep.subr.bf16.mxu0 %v4264_v7  ;;  %v104_v37 = vld [vmem:[%s5423_s0] sm:$0xf]  ;;  %v4293_v41 = vld [vmem:[#allocation5 + $0xc4] ss:$8 sps:$4 sm:$0xff]   ;;  %v409_v42 = vrot.slane %v407_v31, 4  ;;  %v412_v43 = vrot.slane %v410_v32, 5 }
  0x34   :  { %v105_v40 = vld [vmem:[%s5423_s0 + $0x20] sm:$0xf]  ;;  %v423_v44 = vrot.slane %v421_v33, 4  ;;  %v426_v45 = vrot.slane %v424_v34, 5  ;;  %v3698_v46 = vld [vmem:[%s5423_s0 + $0x8] sm:$0xf] }
  0x35   :  { %v416_v47 = vshll.u32 %v400_v36, 16  ;;  %v430_v48 = vshll.u32 %v402_v38, 16  ;;  %v3699_v49 = vld [vmem:[%s5423_s0 + $0xc] sm:$0x1]  ;;  %v3700_v50 = vld [vmem:[%s5423_s0 + $0x28] sm:$0xf]  ;;  %v3647_v53 = vcombine.low %v104_v37, %v105_v40  ;;  %v413_v58 = vor.u32 %v412_v43, %v409_v42 }
  0x36   :  { %234 = vmatpush1.bf16.msra.mxu0 %v4266_v8  ;;  %v579_v51 = vshrl.u32 %v3698_v46, 16  ;;  %v582_v52 = vshll.u32 %v3698_v46, 16  ;;  %v3701_v54 = vld [vmem:[%s5423_s0 + $0x2c] sm:$0x1]  ;;  %v593_v55 = vshrl.u32 %v3700_v50, 16  ;;  %v596_v56 = vshll.u32 %v3700_v50, 16 }
  0x37   :  { %235 = vmatprep.subr.bf16.mxu0 %v4267_v9  ;;  %v4291_v57 = vld [vmem:[#allocation5 + $0xc0] ss:$8 sps:$4 sm:$0xff]   ;;  %v427_v59 = vor.u32 %v426_v45, %v423_v44  ;;  %v4296_v62 = vld [vmem:[#allocation5 + $0xd4] ss:$8 sps:$4 sm:$0xff]   ;;  %v4757_v63 = vrot.slane %v416_v47, 5  ;;  %v4759_v1 = vrot.slane %v430_v48, 5 }
  0x38   :  { %v581_v60 = vrot.slane %v579_v51, 4  ;;  %v584_v61 = vrot.slane %v582_v52, 5  ;;  %v595_v2 = vrot.slane %v593_v55, 4  ;;  %v598_v3 = vrot.slane %v596_v56, 5  ;;  %v3717_v6 = vld [vmem:[%s5423_s0 + $0x10] sm:$0xf] }
  0x39   :  { %v588_v4 = vshll.u32 %v3699_v49, 16  ;;  %v602_v5 = vshll.u32 %v3701_v54, 16  ;;  %v3718_v7 = vld [vmem:[%s5423_s0 + $0x14] sm:$0x1]  ;;  %v4294_v8 = vld [vmem:[#allocation5 + $0xd0] ss:$8 sps:$4 sm:$0xff]  }
  0x3a   :  { %236 = vmatpush1.bf16.msra.mxu0 %v4269_v10  ;;  %v3645_v9 = vld [vmem:[%s5423_s0 + $0x10] sm:$0xf]  ;;  %v3720_v14 = vld [vmem:[%s5423_s0 + $0x34] sm:$0x1]  ;;  %v4297_v31 = vld [vmem:[#allocation5 + $0xe0] ss:$8 sps:$4 sm:$0xff]  }
  0x3b   :  { %237 = vmatprep.subr.bf16.mxu0 %v4270_v11  ;;  %v3646_v10 = vld [vmem:[%s5423_s0 + $0x30] sm:$0xf]  ;;  %v585_v11 = vor.u32 %v584_v61, %v581_v60  ;;  %v4781_v27 = vrot.slane %v588_v4, 5  ;;  %v4783_v28 = vrot.slane %v602_v5, 5  ;;  %vm403_vm1 = vsmask.f32 3328 }
  0x3c   :  { %v3719_v13 = vld [vmem:[%s5423_s0 + $0x30] sm:$0xf]  ;;  %vm404_vm2 = vsmask.f32 7440  ;;  %v3648_v36 = vcombine.low %v3645_v9, %v3646_v10  ;;  %v4305_v43 = vld [vmem:[#allocation5 + $0x104] ss:$8 sps:$4 sm:$0xff]  }
  0x3d   :  { %v765_v20 = vshrl.u32 %v3719_v13, 16  ;;  %v768_v21 = vshll.u32 %v3719_v13, 16  ;;  %v4785_v32 = vrot.slane %v585_v11, 4  ;;  %v4300_v42 = vld [vmem:[#allocation5 + $0xf0] ss:$8 sps:$4 sm:$0xff]   ;;  %vm4801_vm3 = vmor %vm403_vm1, %vm404_vm2  ;;  %vm62_vm4 = vcmask 1040384  }
  0x3e   :  { %238 = vmatpush1.bf16.msra.mxu0 %v4272_v12  ;;  %v599_v12 = vor.u32 %v598_v3, %v595_v2  ;;  %v4303_v44 = vld [vmem:[#allocation5 + $0x100] ss:$8 sps:$4 sm:$0xff]   ;;  %v4308_v45 = vld [vmem:[#allocation5 + $0x114] ss:$8 sps:$4 sm:$0xff]   ;;  %v4306_v47 = vld [vmem:[#allocation5 + $0x110] ss:$8 sps:$4 sm:$0xff]  }
  0x3f   :  { %346 = vmatprep.subr.bf16.mxu0 %v4275_v15  ;;  %v751_v15 = vshrl.u32 %v3717_v6, 16  ;;  %v4311_v48 = vld [vmem:[#allocation5 + $0x124] ss:$8 sps:$4 sm:$0xff]   ;;  %v4309_v49 = vld [vmem:[#allocation5 + $0x120] ss:$8 sps:$4 sm:$0xff]   ;;  %v591_v5 = vsel %vm4801_vm3, %v4785_v32, %v4781_v27  ;;  %vm65_vm5 = vcmask 520196  }
  0x40   :  { %v4787_v33 = vrot.slane %v599_v12, 4  ;;  %v4314_v50 = vld [vmem:[#allocation5 + $0x134] ss:$8 sps:$4 sm:$0xff]   ;;  %v4312_v51 = vld [vmem:[#allocation5 + $0x130] ss:$8 sps:$4 sm:$0xff]   ;;  %vm1018_vm1 = vcmask 1043456  }
  0x41   :  { %3667 = vmatmul.mubr.msk.bf16.vlgmr.msra.gmra.mrb[0].mxu0 %vm220_vm0, %v3653_v16  ;;  %v754_v16 = vshll.u32 %v3717_v6, 16  ;;  %v4317_v52 = vld [vmem:[#allocation5 + $0x144] ss:$8 sps:$4 sm:$0xff]   ;;  %v4315_v55 = vld [vmem:[#allocation5 + $0x140] ss:$8 sps:$4 sm:$0xff]   ;;  %v4352_v32 = vld [vmem:[#allocation8 + $0x130] sm:$0xff]  }
  0x42   :  { %347 = vmatpush1.bf16.msra.mxu0 %v4273_v17  ;;  %269 = vmatprep.mubr.bf16.mxu0 %v4626_v0  ;;  %v4299_v17 = vld [vmem:[#allocation5 + $0xe4] ss:$8 sps:$4 sm:$0xff]   ;;  %v4320_v56 = vld [vmem:[#allocation5 + $0x154] ss:$8 sps:$4 sm:$0xff]   ;;  %v4321_v60 = vld [vmem:[#allocation5 + $0x160] ss:$8 sps:$4 sm:$0xff]   ;;  %v605_v6 = vsel %vm4801_vm3, %v4787_v33, %v4783_v28 }
  0x43   :  { %348 = vmatprep.subr.bf16.mxu0 %v4278_v18  ;;  %v414_v18 = vrot.slane %v413_v58, 4  ;;  %v4318_v58 = vld [vmem:[#allocation5 + $0x150] ss:$8 sps:$4 sm:$0xff]   ;;  %v4326_v61 = vld [vmem:[#allocation5 + $0x174] ss:$8 sps:$4 sm:$0xff]   ;;  %v3702_v9 = vcombine.low %v591_v5, %v605_v6  ;;  %v4350_v28 = vld [vmem:[#allocation8 + $0x128] sm:$0xff]  }
  0x44   :  { %v4332_v2 = vld [vmem:[#allocation5 + $0x194] ss:$8 sps:$4 sm:$0xff]   ;;  %v4330_v3 = vld [vmem:[#allocation5 + $0x190] ss:$8 sps:$4 sm:$0xff]   ;;  %v4335_v4 = vld [vmem:[#allocation5 + $0x1a4] ss:$8 sps:$4 sm:$0xff]  }
  0x45   :  { %v4341_v10 = vld [vmem:[#allocation5 + $0x1c4] ss:$8 sps:$4 sm:$0xff]   ;;  %v4339_v11 = vld [vmem:[#allocation5 + $0x1c0] ss:$8 sps:$4 sm:$0xff]   ;;  %v4344_v12 = vld [vmem:[#allocation5 + $0x1d4] ss:$8 sps:$4 sm:$0xff]  }
  0x46   :  { %349 = vmatpush1.bf16.msra.mxu0 %v4276_v19  ;;  %v428_v19 = vrot.slane %v427_v59, 4  ;;  %v4323_v59 = vld [vmem:[#allocation5 + $0x164] ss:$8 sps:$4 sm:$0xff]   ;;  %v4342_v13 = vld [vmem:[#allocation5 + $0x1d0] ss:$8 sps:$4 sm:$0xff]   ;;  %vm1020_vm2 = vcmask 523268  }
  0x47   :  { %350 = vmatprep.subr.bf16.mxu0 %v4281_v22  ;;  %v753_v22 = vrot.slane %v751_v15, 4  ;;  %vm63_vm6 = vsmask.f32 256  ;;  %vm66_vm7 = vsmask.f32 4352  ;;  %v4353_v33 = vld [vmem:[#allocation8 + $0x88] sm:$0xff]  }
  0x48   :  { %v433_v54 = vsel %vm4801_vm3, %v428_v19, %v4759_v1  ;;  %v4327_v1 = vld [vmem:[#allocation5 + $0x180] ss:$8 sps:$4 sm:$0xff]   ;;  %v4347_v19 = vld [vmem:[#allocation8 + $0x70] sm:$0xff]   ;;  %vm64_vm8 = vmand %vm62_vm4, %vm63_vm6  ;;  %vm81_vm9 = vsmask.f32 7938 }
  0x49   :  { %3668 = vmatmul.mubr.msk.bf16.gmra.mrb[4].mxu0 %vm220_vm0, %v4722_v23  ;;  %vm67_vm10 = vmand %vm65_vm5, %vm66_vm7  ;;  %vm83_vm11 = vsmask.f32 7954  ;;  %v92_v27 = vld [vmem:[#allocation2 + $0x28] sm:$0x11]  ;;  %vm1210_vm7 = vcmask 523264  }
  0x4a   :  { %351 = vmatpush1.bf16.msra.mxu0 %v4279_v24  ;;  %378 = vmatprep.mubr.bf16.mxu0 %v4626_v0  ;;  %v756_v24 = vrot.slane %v754_v16, 5  ;;  %vm4847_vm12 = vmor %vm67_vm10, %vm64_vm8  ;;  %vm1750_vm8 = vcmask 1042432   ;;  %v4420_v46 = vld [vmem:[%s5428_s5 + $0x8] sm:$0xff]  }
  0x4b   :  { %352 = vmatprep.subr.bf16.mxu0 %v4284_v25  ;;  %v760_v25 = vshll.u32 %v3718_v7, 16  ;;  %v4333_v7 = vld [vmem:[#allocation5 + $0x1a0] ss:$8 sps:$4 sm:$0xff]   ;;  %vm82_vm13 = vmand %vm62_vm4, %vm81_vm9 }
  0x4c   :  { %v757_v34 = vor.u32 %v756_v24, %v753_v22  ;;  %v69_v22 = vld [vmem:[#allocation2] sm:$0x11]  ;;  %v86_v24 = vld [vmem:[#allocation2 + $0x8] sm:$0x11]  ;;  %vm84_vm14 = vmand %vm65_vm5, %vm83_vm11 }
  0x4d   :  { %v4789_v38 = vrot.slane %v760_v25, 5  ;;  %v89_v25 = vld [vmem:[#allocation2 + $0x18] sm:$0x11]  ;;  %vm85_vm15 = vmor %vm84_vm14, %vm82_vm13  ;;  %vm4628_vm13 = vmmov 0   ;;  %vm1946_vm14 = vcmask 781313  }
  0x4e   :  { %353 = vmatpush1.bf16.msra.mxu0 %v4282_v26  ;;  %v774_v26 = vshll.u32 %v3720_v14, 16  ;;  %v4793_v40 = vrot.slane %v757_v34, 4  ;;  %v87_v34 = vsel %vm85_vm15, 0, %v86_v24  ;;  %vm1019_vm4 = vmand %vm1018_vm1, %vm81_vm9  ;;  %vm1751_vm9 = vcmask 1046532  }
  0x4f   :  { %354 = vmatprep.subr.bf16.mxu0 %v4287_v29  ;;  %v767_v29 = vrot.slane %v765_v20, 4  ;;  %v4349_v20 = vld [vmem:[#allocation8 + $0x78] sm:$0xff]   ;;  %88 = vst [vmem:[#allocation2 + $0x8] sm:$0x11] %v87_v34  ;;  %vm1021_vm5 = vmand %vm1020_vm2, %vm83_vm11  ;;  %vm98_vm11 = vcmask 778240  }
  0x50   :  { %v763_v14 = vsel %vm4801_vm3, %v4793_v40, %v4789_v38  ;;  %v4354_v38 = vld [vmem:[#allocation8 + $0x138] sm:$0xff]   ;;  %v75_v40 = vld [vmem:[#allocation2 + $0x20] sm:$0x11]  ;;  %vm4870_vm6 = vmor %vm1021_vm5, %vm1019_vm4  ;;  %99 = vst.msk [vmem:[#allocation3] sm:$0x1] %vm98_vm11, %v4626_v0 }
  0x51   :  { %vm4978_vm10 = vmor %vm1750_vm8, %vm1751_vm9  ;;  %100 = vst.msk [vmem:[#allocation3 + $0x8] sm:$0x1] %vm98_vm11, %v4626_v0  ;;  %vm2290_vm2 = vsmask.f32 2304  ;;  %vm2291_vm4 = vsmask.f32 6416 }
  0x52   :  { %355 = vmatpush1.bf16.msra.mxu0 %v4285_v30  ;;  %v770_v30 = vrot.slane %v768_v21, 5  ;;  %v4348_v21 = vld [vmem:[#allocation8 + $0x120] sm:$0xff]   ;;  %vm2292_vm5 = vmor %vm2290_vm2, %vm2291_vm4 }
  0x53   :  { %356 = vmatprep.subr.bf16.mxu0 %v4290_v35  ;;  %v4302_v35 = vld [vmem:[#allocation5 + $0xf4] ss:$8 sps:$4 sm:$0xff]  }
  0x54   :  { %v771_v37 = vor.u32 %v770_v30, %v767_v29  ;;  %v70_v29 = vsel %vm4847_vm12, 0, %v69_v22  ;;  %v95_v30 = vld [vmem:[#allocation2 + $0x38] sm:$0x11] }
  0x55   :  { %71 = vst [vmem:[#allocation2] sm:$0x11] %v70_v29 }
  0x56   :  { %357 = vmatpush1.bf16.msra.mxu0 %v4288_v39  ;;  %v4791_v39 = vrot.slane %v774_v26, 5 }
  0x57   :  { %513 = vmatprep.subr.bf16.mxu0 %v4293_v41  ;;  %v4795_v41 = vrot.slane %v771_v37, 4  ;;  %v96_v37 = vsel %vm85_vm15, 0, %v95_v30 }
  0x58   :  { %97 = vst [vmem:[#allocation2 + $0x38] sm:$0x11] %v96_v37 }
  0x59   :  { %3681 = vmatmul.mubr.msk.bf16.vlgmr.msra.gmra.mrb[0].mxu0 %vm220_vm0, %v3647_v53  ;;  %v419_v53 = vsel %vm4801_vm3, %v414_v18, %v4757_v63  ;;  %v4329_v63 = vld [vmem:[#allocation5 + $0x184] ss:$8 sps:$4 sm:$0xff]   ;;  %v777_v15 = vsel %vm4801_vm3, %v4795_v41, %v4791_v39  ;;  %v4355_v39 = vld [vmem:[#allocation8 + $0x90] sm:$0xff]   ;;  %v76_v41 = vsel %vm4847_vm12, 0, %v75_v40 }
  0x5a   :  { %514 = vmatpush1.bf16.msra.mxu0 %v4291_v57  ;;  %388 = vmatprep.mubr.bf16.mxu0 %v4626_v0  ;;  %v3683_v57 = vcombine.low %v419_v53, %v433_v54  ;;  %v3721_v16 = vcombine.low %v763_v14, %v777_v15  ;;  %v4346_v18 = vld [vmem:[#allocation8 + $0x68] sm:$0xff]   ;;  %77 = vst [vmem:[#allocation2 + $0x20] sm:$0x11] %v76_v41  ;;  %v4362_v54 = vld [vmem:[#allocation8 + $0x158] sm:$0xff]  }
  0x5b   :  { %515 = vmatprep.subr.bf16.mxu0 %v4296_v62  ;;  %v4324_v62 = vld [vmem:[#allocation5 + $0x170] ss:$8 sps:$4 sm:$0xff]   ;;  %v4361_v53 = vld [vmem:[#allocation8 + $0xa8] sm:$0xff]  }
  0x5e   :  { %516 = vmatpush1.bf16.msra.mxu0 %v4294_v8  ;;  %v4338_v8 = vld [vmem:[#allocation5 + $0x1b4] ss:$8 sps:$4 sm:$0xff]  }
  0x5f   :  { %517 = vmatprep.subr.bf16.mxu0 %v4299_v17  ;;  %v4345_v17 = vld [vmem:[#allocation8 + $0x60] sm:$0xff]  }
  0x60   :  { %1215 = vmatpush1.bf16.msra.mxu1 %v4345_v17 }
  0x61   :  { %3682 = vmatmul.mubr.msk.bf16.gmra.mrb[4].mxu0 %vm220_vm0, %v3648_v36  ;;  %1216 = vmatprep.subr.bf16.mxu1 %v4626_v0 }
  0x62   :  { %518 = vmatpush1.bf16.msra.mxu0 %v4297_v31  ;;  %545 = vmatprep.mubr.bf16.mxu0 %v4626_v0  ;;  %v4351_v31 = vld [vmem:[#allocation8 + $0x80] sm:$0xff]  }
  0x63   :  { %519 = vmatprep.subr.bf16.mxu0 %v4302_v35  ;;  %v90_v35 = vsel %vm85_vm15, 0, %v89_v25 }
  0x64   :  { %1217 = vmatpush1.bf16.msra.mxu1 %v4346_v18  ;;  %91 = vst [vmem:[#allocation2 + $0x18] sm:$0x11] %v90_v35 }
  0x65   :  { %1218 = vmatprep.subr.bf16.mxu1 %v4626_v0 }
  0x66   :  { %520 = vmatpush1.bf16.msra.mxu0 %v4300_v42  ;;  %v4356_v42 = vld [vmem:[#allocation8 + $0x140] sm:$0xff]  }
  0x67   :  { %521 = vmatprep.subr.bf16.mxu0 %v4305_v43  ;;  %v4357_v43 = vld [vmem:[#allocation8 + $0x98] sm:$0xff]  }
  0x68   :  { %1219 = vmatpush1.bf16.msra.mxu1 %v4347_v19 }
  0x69   :  { %1220 = vmatprep.subr.bf16.mxu1 %v4626_v0 }
  0x6a   :  { %522 = vmatpush1.bf16.msra.mxu0 %v4303_v44  ;;  %v72_v44 = vld [vmem:[#allocation2 + $0x10] sm:$0x11] }
  0x6b   :  { %523 = vmatprep.subr.bf16.mxu0 %v4308_v45  ;;  %v73_v45 = vsel %vm4847_vm12, 0, %v72_v44 }
  0x6c   :  { %1221 = vmatpush1.bf16.msra.mxu1 %v4349_v20  ;;  %74 = vst [vmem:[#allocation2 + $0x10] sm:$0x11] %v73_v45 }
  0x6d   :  { %1222 = vmatprep.subr.bf16.mxu1 %v4626_v0 }
  0x6e   :  { %524 = vmatpush1.bf16.msra.mxu0 %v4306_v47  ;;  %v4358_v47 = vld [vmem:[#allocation8 + $0x148] sm:$0xff]  }
  0x6f   :  { %685 = vmatprep.subr.bf16.mxu0 %v4311_v48  ;;  %v4359_v48 = vld [vmem:[#allocation8 + $0xa0] sm:$0xff]  }
  0x70   :  { %1223 = vmatpush1.bf16.msra.mxu1 %v4351_v31 }
  0x71   :  { %3696 = vmatmul.mubr.msk.bf16.vlgmr.msra.gmra.mrb[0].mxu0 %vm220_vm0, %v3648_v36  ;;  %v93_v36 = vsel %vm85_vm15, 0, %v92_v27  ;;  %1224 = vmatprep.subr.bf16.mxu1 %v4626_v0  ;;  %vm2434_vm15 = vcmask 1045508  }
  0x72   :  { %686 = vmatpush1.bf16.msra.mxu0 %v4309_v49  ;;  %555 = vmatprep.mubr.bf16.mxu0 %v4626_v0  ;;  %94 = vst [vmem:[#allocation2 + $0x28] sm:$0x11] %v93_v36 }
  0x73   :  { %687 = vmatprep.subr.bf16.mxu0 %v4314_v50  ;;  %v78_v50 = vld [vmem:[#allocation2 + $0x30] sm:$0x11] }
  0x74   :  { %1225 = vmatpush1.bf16.msra.mxu1 %v4353_v33 }
  0x75   :  { %1226 = vmatprep.subr.bf16.mxu1 %v4626_v0 }
  0x76   :  { %688 = vmatpush1.bf16.msra.mxu0 %v4312_v51  ;;  %v79_v51 = vsel %vm4847_vm12, 0, %v78_v50 }
  0x77   :  { %689 = vmatprep.subr.bf16.mxu0 %v4317_v52  ;;  %80 = vst [vmem:[#allocation2 + $0x30] sm:$0x11] %v79_v51  ;;  %v4360_v52 = vld [vmem:[#allocation8 + $0x150] sm:$0xff]  }
  0x78   :  { %1227 = vmatpush1.bf16.msra.mxu1 %v4355_v39 }
  0x79   :  { %3697 = vmatmul.mubr.msk.bf16.gmra.mrb[4].mxu0 %vm220_vm0, %v3683_v57  ;;  %1228 = vmatprep.subr.bf16.mxu1 %v4626_v0 }
  0x7a   :  { %690 = vmatpush1.bf16.msra.mxu0 %v4315_v55  ;;  %717 = vmatprep.mubr.bf16.mxu0 %v4626_v0  ;;  %v4363_v55 = vld [vmem:[#allocation8 + $0xb0] sm:$0xff]  }
  0x7b   :  { %691 = vmatprep.subr.bf16.mxu0 %v4320_v56  ;;  %v4364_v56 = vld [vmem:[#allocation8 + $0x160] sm:$0xff]  }
  0x7c   :  { %1229 = vmatpush1.bf16.msra.mxu1 %v4357_v43 }
  0x7d   :  { %1230 = vmatprep.subr.bf16.mxu1 %v4626_v0 }
  0x7e   :  { %692 = vmatpush1.bf16.msra.mxu0 %v4318_v58  ;;  %v4366_v58 = vld [vmem:[#allocation8 + $0x168] sm:$0xff]  }
  0x7f   :  { %693 = vmatprep.subr.bf16.mxu0 %v4323_v59  ;;  %v4368_v59 = vld [vmem:[#allocation8 + $0x170] sm:$0xff]  }
  0x80   :  { %1231 = vmatpush1.bf16.msra.mxu1 %v4359_v48 }
  0x81   :  { %1232 = vmatprep.subr.bf16.mxu1 %v4626_v0 }
  0x82   :  { %694 = vmatpush1.bf16.msra.mxu0 %v4321_v60  ;;  %v4370_v60 = vld [vmem:[#allocation8 + $0x178] sm:$0xff]  }
  0x83   :  { %695 = vmatprep.subr.bf16.mxu0 %v4326_v61  ;;  %v920_v61 = vlaneseq }
  0x84   :  { %1233 = vmatpush1.bf16.msra.mxu1 %v4361_v53 }
  0x85   :  { %1234 = vmatprep.subr.bf16.mxu1 %v4626_v0 }
  0x86   :  { %696 = vmatpush1.bf16.msra.mxu0 %v4324_v62  ;;  %v4887_v62 = vshrl.u32 %v920_v61, 7 }
  0x87   :  { %857 = vmatprep.subr.bf16.mxu0 %v4329_v63 }
  0x88   :  { %1235 = vmatpush1.bf16.msra.mxu1 %v4363_v55  ;;  %v922_v63 = vsub.s32 0, %v4887_v62 }
  0x89   :  { %3715 = vmatmul.mubr.msk.bf16.vlgmr.msra.gmra.mrb[0].mxu0 %vm220_vm0, %v4722_v23  ;;  %v4336_v23 = vld [vmem:[#allocation5 + $0x1b0] ss:$8 sps:$4 sm:$0xff]   ;;  %1236 = vmatprep.subr.bf16.mxu1 %v4626_v0 }
  0x8a   :  { %858 = vmatpush1.bf16.msra.mxu0 %v4327_v1  ;;  %727 = vmatprep.mubr.bf16.mxu0 %v4626_v0  ;;  %v918_v1 = vld [vmem:[%s5425_s2] sm:$0x3] }
  0x8b   :  { %859 = vmatprep.subr.bf16.mxu0 %v4332_v2  ;;  %v926_v2 = vsub.s32 1, %v4887_v62 }
  0x8e   :  { %860 = vmatpush1.bf16.msra.mxu0 %v4330_v3  ;;  %v923_v3 = vrot.slane %v918_v1, %v922_v63 }
  0x8f   :  { %861 = vmatprep.subr.bf16.mxu0 %v4335_v4  ;;  %v927_v4 = vrot.slane %v918_v1, %v926_v2 }
  0x91   :  { %3716 = vmatmul.mubr.msk.bf16.gmra.mrb[4].mxu0 %vm220_vm0, %v3702_v9 }
  0x92   :  { %862 = vmatpush1.bf16.msra.mxu0 %v4333_v7  ;;  %889 = vmatprep.mubr.bf16.mxu0 %v4626_v0 }
  0x93   :  { %863 = vmatprep.subr.bf16.mxu0 %v4338_v8 }
  0x96   :  { %864 = vmatpush1.bf16.msra.mxu0 %v4336_v23 }
  0x97   :  { %865 = vmatprep.subr.bf16.mxu0 %v4341_v10 }
  0x9a   :  { %866 = vmatpush1.bf16.msra.mxu0 %v4339_v11 }
  0x9b   :  { %867 = vmatprep.subr.bf16.mxu0 %v4344_v12 }
  0x9e   :  { %868 = vmatpush1.bf16.msra.mxu0 %v4342_v13 }
  0x9f   :  { %1701 = vmatprep.subr.bf16.mxu0 %v4626_v0 }
  0xa1   :  { %3734 = vmatmul.mubr.msk.bf16.vlgmr.msra.gmra.mrb[0].mxu0 %vm220_vm0, %v3683_v57  ;;  %v4365_v57 = vld [vmem:[#allocation8 + $0xb8] sm:$0xff]  }
  0xa2   :  { %899 = vmatprep.mubr.bf16.mxu0 %v4626_v0  ;;  %1702 = vmatpush1.bf16.msra.mxu0 %v4348_v21 }
  0xa3   :  { %1703 = vmatprep.subr.bf16.mxu0 %v4626_v0  ;;  %1237 = vmatpush1.bf16.msra.mxu1 %v4365_v57 }
  0xa4   :  { %1339 = vmatprep.subr.bf16.mxu1 %v4626_v0 }
  0xa6   :  { %1704 = vmatpush1.bf16.msra.mxu0 %v4350_v28 }
  0xa7   :  { %1705 = vmatprep.subr.bf16.mxu0 %v4626_v0 }
  0xa9   :  { %3735 = vmatmul.mubr.msk.bf16.gmra.mrb[4].mxu0 %vm220_vm0, %v3721_v16 }
  0xaa   :  { %1706 = vmatpush1.bf16.msra.mxu0 %v4352_v32 }
  0xab   :  { %1707 = vmatprep.subr.bf16.mxu0 %v4626_v0 }
  0xae   :  { %1708 = vmatpush1.bf16.msra.mxu0 %v4354_v38 }
  0xaf   :  { %1709 = vmatprep.subr.bf16.mxu0 %v4626_v0 }
  0xb2   :  { %1710 = vmatpush1.bf16.msra.mxu0 %v4356_v42 }
  0xb3   :  { %1711 = vmatprep.subr.bf16.mxu0 %v4626_v0 }
  0xb6   :  { %1712 = vmatpush1.bf16.msra.mxu0 %v4358_v47 }
  0xb7   :  { %1713 = vmatprep.subr.bf16.mxu0 %v4626_v0 }
  0xba   :  { %1714 = vmatpush1.bf16.msra.mxu0 %v4360_v52 }
  0xbb   :  { %1715 = vmatprep.subr.bf16.mxu0 %v4626_v0 }
  0xbe   :  { %1716 = vmatpush1.bf16.msra.mxu0 %v4362_v54 }
  0xbf   :  { %1717 = vmatprep.subr.bf16.mxu0 %v4626_v0 }
  0xc2   :  { %1718 = vmatpush1.bf16.msra.mxu0 %v4364_v56 }
  0xc3   :  { %1719 = vmatprep.subr.bf16.mxu0 %v4626_v0 }
  0xc6   :  { %1720 = vmatpush1.bf16.msra.mxu0 %v4366_v58  ;;  %v1023_v58 = vld [vmem:[#allocation2] sm:$0xff] }
  0xc7   :  { %1721 = vmatprep.subr.bf16.mxu0 %v4626_v0 }
  0xca   :  { %1722 = vmatpush1.bf16.msra.mxu0 %v4368_v59  ;;  %v1026_v59 = vld [vmem:[#allocation2 + $0x8] sm:$0x11] }
  0xcb   :  { %1723 = vmatprep.subr.bf16.mxu0 %v4626_v0 }
  0xce   :  { %1724 = vmatpush1.bf16.msra.mxu0 %v4370_v60 }
 0x174   :  { %v891_v5 = vpop.f32.mrb[0].mxu0 }
 0x175   :  { %v930_v6 = vadd.f32 %v923_v3, %v891_v5  ;;  %v893_v7 = vpop.f32.mrb[1].mxu0  ;;  %v1032_v5 = vld [vmem:[#allocation2 + $0x28] sm:$0x11] }
 0x176   :  { %v931_v8 = vadd.f32 %v927_v4, %v893_v7  ;;  %v895_v9 = vpop.f32.mrb[2].mxu0 }
 0x177   :  { %v3736_v23 = vmul.f32 -1.442695, %v930_v6  ;;  %v932_v10 = vadd.f32 %v923_v3, %v895_v9  ;;  %v897_v11 = vpop.f32.mrb[3].mxu0 }
 0x178   :  { %v3737_v12 = vmul.f32 -1.442695, %v931_v8  ;;  %v933_v13 = vadd.f32 %v927_v4, %v897_v11 }
 0x179   :  { %4500 = vpow2.f32 %v3736_v23  ;;  %v3738_v14 = vmul.f32 -1.442695, %v932_v10 }
 0x17a   :  { %4502 = vpow2.f32 %v3737_v12  ;;  %v3739_v15 = vmul.f32 -1.442695, %v933_v13 }
 0x17b   :  { %4504 = vpow2.f32 %v3738_v14 }
 0x17c   :  { %4506 = vpow2.f32 %v3739_v15  ;;  %v901_v16 = vpop.f32.mrb[4].mxu0 }
 0x17d   :  { %v934_v17 = vadd.f32 %v923_v3, %v901_v16  ;;  %v903_v18 = vpop.f32.mrb[5].mxu0 }
 0x17e   :  { %v935_v19 = vadd.f32 %v927_v4, %v903_v18  ;;  %v905_v20 = vpop.f32.mrb[6].mxu0 }
 0x17f   :  { %v3740_v21 = vmul.f32 -1.442695, %v934_v17  ;;  %v936_v22 = vadd.f32 %v923_v3, %v905_v20  ;;  %v907_v24 = vpop.f32.mrb[7].mxu0 }
 0x180   :  { %v3741_v25 = vmul.f32 -1.442695, %v935_v19  ;;  %v937_v27 = vadd.f32 %v927_v4, %v907_v24  ;;  %v1029_v4 = vld [vmem:[#allocation2 + $0x20] sm:$0xff] }
 0x181   :  { %4508 = vpow2.f32 %v3740_v21  ;;  %v3742_v28 = vmul.f32 -1.442695, %v936_v22 }
 0x182   :  { %4510 = vpow2.f32 %v3741_v25  ;;  %v3743_v29 = vmul.f32 -1.442695, %v937_v27 }
 0x183   :  { %v4501_v30 = vpop.eup %4500  ;;  %4512 = vpow2.f32 %v3742_v28 }
 0x184   :  { %v4503_v31 = vpop.eup %4502  ;;  %v962_v32 = vadd.f32 1.0, %v4501_v30  ;;  %4514 = vpow2.f32 %v3743_v29  ;;  %v1064_v29 = vld [vmem:[#allocation2 + $0x10] sm:$0xff]  ;;  %v1067_v30 = vld [vmem:[#allocation2 + $0x18] sm:$0x11] }
 0x185   :  { %v4505_v33 = vpop.eup %4504  ;;  %v963_v34 = vadd.f32 1.0, %v4503_v31 }
 0x186   :  { %v4507_v35 = vpop.eup %4506  ;;  %4516 = vrcp.f32 %v962_v32  ;;  %v964_v36 = vadd.f32 1.0, %v4505_v33 }
 0x187   :  { %4518 = vrcp.f32 %v963_v34  ;;  %v965_v37 = vadd.f32 1.0, %v4507_v35  ;;  %v1070_v35 = vld [vmem:[#allocation2 + $0x30] sm:$0xff] }
 0x188   :  { %4520 = vrcp.f32 %v964_v36  ;;  %v1073_v36 = vld [vmem:[#allocation2 + $0x38] sm:$0x11] }
 0x189   :  { %4522 = vrcp.f32 %v965_v37 }
 0x18b   :  { %v4509_v38 = vpop.eup %4508 }
 0x18c   :  { %v4511_v39 = vpop.eup %4510  ;;  %v966_v40 = vadd.f32 1.0, %v4509_v38 }
 0x18d   :  { %v4513_v41 = vpop.eup %4512  ;;  %v967_v42 = vadd.f32 1.0, %v4511_v39 }
 0x18e   :  { %v4515_v43 = vpop.eup %4514  ;;  %4524 = vrcp.f32 %v966_v40  ;;  %v968_v44 = vadd.f32 1.0, %v4513_v41 }
 0x18f   :  { %4526 = vrcp.f32 %v967_v42  ;;  %v969_v45 = vadd.f32 1.0, %v4515_v43 }
 0x190   :  { %v4517_v47 = vpop.eup %4516  ;;  %4528 = vrcp.f32 %v968_v44 }
 0x191   :  { %v4519_v48 = vpop.eup %4518  ;;  %4530 = vrcp.f32 %v969_v45 }
 0x192   :  { %v4521_v50 = vpop.eup %4520  ;;  %v4000_v51 = vpack.c.bf16 %v4519_v48, %v4517_v47 }
 0x193   :  { %v4523_v52 = vpop.eup %4522 }
 0x194   :  { %v999_v53 = vshrl.u32 %v4000_v51, 16  ;;  %v4001_v54 = vpack.c.bf16 %v4523_v52, %v4521_v50  ;;  %v1002_v56 = vshll.u32 %v4000_v51, 16 }
 0x196   :  { %v1001_v55 = vrot.slane %v999_v53, 7  ;;  %v1007_v57 = vshrl.u32 %v4001_v54, 16  ;;  %v1010_v2 = vshll.u32 %v4001_v54, 16 }
 0x198   :  { %v4525_v60 = vpop.eup %4524  ;;  %v1004_v61 = vor.u32 %v1002_v56, %v1001_v55  ;;  %v1005_v63 = vrot.slane %v1001_v55, 4  ;;  %v1009_v1 = vrot.slane %v1007_v57, 7  ;;  %v4367_v56 = vld [vmem:[#allocation8] sm:$0xff]  }
 0x199   :  { %v4527_v3 = vpop.eup %4526 }
 0x19a   :  { %v4529_v6 = vpop.eup %4528  ;;  %v4896_v7 = vsel %vm4870_vm6, %v1004_v61, %v1023_v58  ;;  %v1027_v8 = vsel %vm4847_vm12, %v1005_v63, %v1026_v59  ;;  %v1012_v9 = vor.u32 %v1010_v2, %v1009_v1  ;;  %v1013_v23 = vrot.slane %v1009_v1, 4  ;;  %v4369_v1 = vld [vmem:[#allocation8 + $0x8] sm:$0xff]  }
 0x19b   :  { %v4531_v10 = vpop.eup %4530  ;;  %1025 = vst [vmem:[#allocation2] sm:$0xff] %v4896_v7  ;;  %1028 = vst [vmem:[#allocation2 + $0x8] sm:$0x11] %v1027_v8  ;;  %v4002_v11 = vpack.c.bf16 %v4527_v3, %v4525_v60  ;;  %v1385_v12 = vshrl.u32 %v4896_v7, 16  ;;  %v1388_v13 = vshll.u32 %v4896_v7, 16 }
 0x19c   :  { %v4905_v14 = vsel %vm4870_vm6, %v1012_v9, %v1029_v4  ;;  %v1033_v15 = vsel %vm4847_vm12, %v1013_v23, %v1032_v5  ;;  %v4003_v16 = vpack.c.bf16 %v4531_v10, %v4529_v6 }
 0x19d   :  { %1031 = vst [vmem:[#allocation2 + $0x20] sm:$0xff] %v4905_v14  ;;  %1034 = vst [vmem:[#allocation2 + $0x28] sm:$0x11] %v1033_v15  ;;  %v1044_v17 = vshrl.u32 %v4002_v11, 16  ;;  %v3764_v18 = vcombine.high %v4896_v7, %v4905_v14  ;;  %v3763_v19 = vcombine.low %v4896_v7, %v4905_v14  ;;  %v1387_v21 = vrot.slane %v1385_v12, 4  ;;  %v4371_v15 = vld [vmem:[#allocation8 + $0x10] sm:$0xff]  }
 0x19e   :  { %v1052_v20 = vshrl.u32 %v4003_v16, 16  ;;  %v1390_v22 = vrot.slane %v1388_v13, 5  ;;  %v1047_v25 = vshll.u32 %v4002_v11, 16  ;;  %v1399_v27 = vshrl.u32 %v4905_v14, 16  ;;  %v4386_v7 = vld [vmem:[#allocation8 + $0xe8] sm:$0xff]  }
 0x19f   :  { %v1046_v24 = vrot.slane %v1044_v17, 7  ;;  %v1402_v28 = vshll.u32 %v4905_v14, 16  ;;  %v1055_v32 = vshll.u32 %v4003_v16, 16  ;;  %v4387_v14 = vld [vmem:[#allocation8 + $0xf0] sm:$0xff]  }
 0x1a0   :  { %v1054_v31 = vrot.slane %v1052_v20, 7  ;;  %v1401_v37 = vrot.slane %v1399_v27, 4  ;;  %v1391_v42 = vor.u32 %v1390_v22, %v1387_v21 }
 0x1a1   :  { %v1049_v33 = vor.u32 %v1047_v25, %v1046_v24  ;;  %v1050_v34 = vrot.slane %v1046_v24, 4  ;;  %v1404_v38 = vrot.slane %v1402_v28, 5  ;;  %v4372_v25 = vld [vmem:[#allocation8 + $0x18] sm:$0xff]  }
 0x1a2   :  { %v1057_v39 = vor.u32 %v1055_v32, %v1054_v31  ;;  %v1058_v40 = vrot.slane %v1054_v31, 4  ;;  %v4916_v41 = vld [vmem:[#allocation2 + $0x8] sm:$0x11]  ;;  %v1392_v2 = vrot.slane %v1391_v42, 4  ;;  %v4376_v32 = vld [vmem:[#allocation8 + $0x38] sm:$0xff]   ;;  %v4385_v42 = vld [vmem:[#allocation8 + $0xe0] sm:$0xff]  }
 0x1a3   :  { %v1065_v43 = vsel %vm4870_vm6, %v1049_v33, %v1064_v29  ;;  %v1068_v44 = vsel %vm4847_vm12, %v1050_v34, %v1067_v30  ;;  %v1394_v45 = vshll.u32 %v4916_v41, 16  ;;  %v1405_v47 = vor.u32 %v1404_v38, %v1401_v37  ;;  %v4373_v29 = vld [vmem:[#allocation8 + $0x20] sm:$0xff]   ;;  %v4374_v30 = vld [vmem:[#allocation8 + $0x28] sm:$0xff]   ;;  %v4375_v31 = vld [vmem:[#allocation8 + $0x30] sm:$0xff]  }
 0x1a4   :  { %1066 = vst [vmem:[#allocation2 + $0x10] sm:$0xff] %v1065_v43  ;;  %1069 = vst [vmem:[#allocation2 + $0x18] sm:$0x11] %v1068_v44  ;;  %v1071_v48 = vsel %vm4870_vm6, %v1057_v39, %v1070_v35  ;;  %v1074_v50 = vsel %vm4847_vm12, %v1058_v40, %v1073_v36  ;;  %v1567_v51 = vshrl.u32 %v1065_v43, 16  ;;  %v1570_v52 = vshll.u32 %v1065_v43, 16  ;;  %v4377_v33 = vld [vmem:[#allocation8 + $0x40] sm:$0xff]  }
 0x1a5   :  { %v4927_v53 = vld [vmem:[#allocation2 + $0x28] sm:$0x11]  ;;  %1072 = vst [vmem:[#allocation2 + $0x30] sm:$0xff] %v1071_v48  ;;  %1075 = vst [vmem:[#allocation2 + $0x38] sm:$0x11] %v1074_v50  ;;  %v3748_v54 = vcombine.low %v1065_v43, %v1071_v48  ;;  %v3749_v55 = vcombine.high %v1065_v43, %v1071_v48  ;;  %v1581_v57 = vshrl.u32 %v1071_v48, 16 }
 0x1a6   :  { %v1584_v58 = vshll.u32 %v1071_v48, 16  ;;  %v1569_v59 = vrot.slane %v1567_v51, 4  ;;  %v1572_v60 = vrot.slane %v1570_v52, 5  ;;  %v1396_v63 = vrot.slane %v1394_v45, 5  ;;  %v4378_v34 = vld [vmem:[#allocation8 + $0x48] sm:$0xff]   ;;  %v4379_v35 = vld [vmem:[#allocation8 + $0x50] sm:$0xff]  }
 0x1a7   :  { %3762 = vmatprep.mubr.msk.bf16.mxu1 %vm1210_vm7, %v3749_v55  ;;  %v1583_v49 = vrot.slane %v1581_v57, 4  ;;  %v1408_v26 = vshll.u32 %v4927_v53, 16  ;;  %v1406_v3 = vrot.slane %v1405_v47, 4  ;;  %v4380_v36 = vld [vmem:[#allocation8 + $0x58] sm:$0xff]   ;;  %v4381_v37 = vld [vmem:[#allocation8 + $0xc0] sm:$0xff]   ;;  %v4382_v38 = vld [vmem:[#allocation8 + $0xc8] sm:$0xff]  }
 0x1a8   :  { %v1586_v61 = vrot.slane %v1584_v58, 5  ;;  %1247 = vmatmul.mubr.bf16.vlgmr.msra.gmra.mrb[0].mxu1 %v3748_v54  ;;  %v1573_v6 = vor.u32 %v1572_v60, %v1569_v59  ;;  %v4935_v9 = vsel %vm4801_vm3, %v1392_v2, %v1396_v63  ;;  %v4383_v39 = vld [vmem:[#allocation8 + $0xd0] sm:$0xff]   ;;  %v4384_v40 = vld [vmem:[#allocation8 + $0xd8] sm:$0xff]   ;;  %v4389_v43 = vld [vmem:[#allocation8 + $0x100] sm:$0xff]   ;;  %v1759_v51 = vrot.slane %v4927_v53, 5 }
 0x1a9   :  { %1340 = vmatpush1.bf16.msra.mxu1 %v4367_v56  ;;  %3777 = vmatprep.mubr.msk.bf16.mxu1 %vm1210_vm7, %v3764_v18  ;;  %v1410_v4 = vrot.slane %v1408_v26, 5  ;;  %v4390_v44 = vld [vmem:[#allocation8 + $0x108] sm:$0xff]   ;;  %v4391_v45 = vld [vmem:[#allocation8 + $0x110] sm:$0xff]   ;;  %v4392_v52 = vld [vmem:[#allocation8 + $0x118] sm:$0xff]   ;;  %v1755_v55 = vrot.slane %v4916_v41, 5  ;;  %vm101_vm12 = vcmask 779265  }
 0x1aa   :  { %1341 = vmatprep.subr.bf16.mxu1 %v4626_v0  ;;  %v1587_v8 = vor.u32 %v1586_v61, %v1583_v49  ;;  %v1574_v18 = vrot.slane %v1573_v6, 4  ;;  %v1745_v47 = vld [vmem:[#allocation2 + $0x20] sm:$0xee]  ;;  %v4393_v58 = vld [vmem:[#allocation8 + $0x180] sm:$0xff]   ;;  %v4395_v60 = vld [vmem:[#allocation8 + $0x190] sm:$0xff]  }
 0x1ab   :  { %v1563_v5 = vld [vmem:[#allocation2 + $0x18] sm:$0x11]  ;;  %v4939_v23 = vsel %vm4801_vm3, %v1406_v3, %v1410_v4  ;;  %v1744_v48 = vld [vmem:[#allocation2] sm:$0xee]  ;;  %v3809_v50 = vrot.slane %v1745_v47, 9  ;;  %v4396_v49 = vld [vmem:[#allocation8 + $0x198] sm:$0xff]  }
 0x1ac   :  { %v1565_v10 = vld [vmem:[#allocation2 + $0x38] sm:$0x11]  ;;  %v1576_v11 = vshll.u32 %v1563_v5, 16  ;;  %v3779_v12 = vcombine.high %v4935_v9, %v4939_v23  ;;  %v3778_v13 = vcombine.low %v4935_v9, %v4939_v23  ;;  %v1588_v20 = vrot.slane %v1587_v8, 4  ;;  %v4394_v41 = vld [vmem:[#allocation8 + $0x188] sm:$0xff]   ;;  %v4399_v26 = vld [vmem:[#allocation8 + $0x1b0] sm:$0xff]  }
 0x1ad   :  { %1342 = vmatpush1.bf16.msra.mxu1 %v4369_v1  ;;  %v1590_v16 = vshll.u32 %v1565_v10, 16  ;;  %v3808_v54 = vrot.slane %v1744_v48, 9  ;;  %v1760_v57 = vsel %vm4978_vm10, %v3809_v50, %v1759_v51  ;;  %v4397_v61 = vld [vmem:[#allocation8 + $0x1a0] sm:$0xff]   ;;  %v4398_v63 = vld [vmem:[#allocation8 + $0x1a8] sm:$0xff]   ;;  %v4400_v1 = vld [vmem:[#allocation8 + $0x1b8] sm:$0xff]  }
 0x1ae   :  { %1343 = vmatprep.subr.bf16.mxu1 %v4626_v0  ;;  %v1578_v17 = vrot.slane %v1576_v11, 5  ;;  %v4401_v2 = vld [vmem:[#allocation8 + $0x1c0] sm:$0xff]   ;;  %v4402_v3 = vld [vmem:[#allocation8 + $0x1c8] sm:$0xff]   ;;  %v4403_v4 = vld [vmem:[#allocation8 + $0x1d0] sm:$0xff]   ;;  %102 = vst.msk [vmem:[#allocation3 + $0x4] sm:$0x2] %vm101_vm12, %v4626_v0 }
 0x1af   :  { %v1592_v21 = vrot.slane %v1590_v16, 5  ;;  %v1756_v53 = vsel %vm4978_vm10, %v3808_v54, %v1755_v55  ;;  %v4404_v5 = vld [vmem:[#allocation8 + $0x1d8] sm:$0xff]   ;;  %v4405_v16 = vld [vmem:[%s5428_s5 + $0x60] sm:$0xff]   ;;  %103 = vst.msk [vmem:[#allocation3 + $0xc] sm:$0x2] %vm101_vm12, %v4626_v0 }
 0x1b0   :  { %v1579_v22 = vsel %vm4801_vm3, %v1574_v18, %v1578_v17  ;;  %v3811_v59 = vcombine.high %v1756_v53, %v1760_v57  ;;  %v3810_v6 = vcombine.low %v1756_v53, %v1760_v57  ;;  %v4627_v17 = vmov 0.0  }
 0x1b1   :  { %1344 = vmatpush1.bf16.msra.mxu1 %v4371_v15  ;;  %v1593_v24 = vsel %vm4801_vm3, %v1588_v20, %v1592_v21  ;;  %4131 = vmatprep.subr.bf16.mxu0 %v4627_v17 }
 0x1b2   :  { %v3793_v27 = vcombine.low %v1579_v22, %v1593_v24  ;;  %v3794_v28 = vcombine.high %v1579_v22, %v1593_v24  ;;  %1345 = vmatprep.subr.bf16.mxu1 %v4626_v0  ;;  %v4406_v24 = vld [vmem:[%s5428_s5 + $0x30] sm:$0xff]  }
 0x1b4   :  { %3807 = vmatprep.mubr.msk.bf16.mxu0 %vm1210_vm7, %v3794_v28 }
 0x1b5   :  { %1734 = vmatmul.mubr.bf16.vlgmr.msra.gmra.mrb[8].mxu0 %v3793_v27  ;;  %1346 = vmatpush1.bf16.msra.mxu1 %v4372_v25  ;;  %v4407_v25 = vld [vmem:[%s5428_s5 + $0x68] sm:$0xff]  }
 0x1b6   :  { %1347 = vmatprep.subr.bf16.mxu1 %v4626_v0  ;;  %4132 = vmatpush3.bf16.msra.mxu0 %v4406_v24 }
 0x1b7   :  { %4133 = vmatprep.subr.bf16.mxu0 %v4627_v17  ;;  %4143 = vmatprep.mubr.msk.bf16.mxu0 %vm4628_vm13, %v4627_v17 }
 0x1b9   :  { %1348 = vmatpush1.bf16.msra.mxu1 %v4373_v29  ;;  %v4408_v29 = vld [vmem:[%s5428_s5 + $0x38] sm:$0xff]  }
 0x1ba   :  { %1349 = vmatprep.subr.bf16.mxu1 %v4626_v0  ;;  %4134 = vmatpush3.bf16.msra.mxu0 %v4408_v29 }
 0x1bb   :  { %4135 = vmatprep.subr.bf16.mxu0 %v4627_v17 }
 0x1bd   :  { %1350 = vmatpush1.bf16.msra.mxu1 %v4374_v30  ;;  %v4409_v30 = vld [vmem:[%s5428_s5 + $0x70] sm:$0xff]  }
 0x1be   :  { %1351 = vmatprep.subr.bf16.mxu1 %v4626_v0 }
 0x1c1   :  { %1352 = vmatpush1.bf16.msra.mxu1 %v4375_v31  ;;  %v4410_v31 = vld [vmem:[%s5428_s5 + $0x40] sm:$0xff]  }
 0x1c2   :  { %1353 = vmatprep.subr.bf16.mxu1 %v4626_v0  ;;  %4136 = vmatpush3.bf16.msra.mxu0 %v4410_v31 }
 0x1c3   :  { %4137 = vmatprep.subr.bf16.mxu0 %v4627_v17 }
 0x1c5   :  { %1354 = vmatpush1.bf16.msra.mxu1 %v4376_v32  ;;  %v4411_v32 = vld [vmem:[%s5428_s5 + $0x78] sm:$0xff]  }
 0x1c6   :  { %1355 = vmatprep.subr.bf16.mxu1 %v4626_v0 }
 0x1c9   :  { %1356 = vmatpush1.bf16.msra.mxu1 %v4377_v33  ;;  %v4412_v33 = vld [vmem:[%s5428_s5 + $0x48] sm:$0xff]  }
 0x1ca   :  { %1357 = vmatprep.subr.bf16.mxu1 %v4626_v0  ;;  %4138 = vmatpush3.bf16.msra.mxu0 %v4412_v33 }
 0x1cb   :  { %4139 = vmatprep.subr.bf16.mxu0 %v4627_v17 }
 0x1cd   :  { %1358 = vmatpush1.bf16.msra.mxu1 %v4378_v34  ;;  %v4413_v34 = vld [vmem:[%s5428_s5 + $0x80] sm:$0xff]  }
 0x1ce   :  { %1359 = vmatprep.subr.bf16.mxu1 %v4626_v0 }
 0x1d1   :  { %1360 = vmatpush1.bf16.msra.mxu1 %v4379_v35  ;;  %v4415_v35 = vld [vmem:[%s5428_s5 + $0x88] sm:$0xff]  }
 0x1d2   :  { %1361 = vmatprep.subr.bf16.mxu1 %v4626_v0 }
 0x1d5   :  { %1362 = vmatpush1.bf16.msra.mxu1 %v4380_v36  ;;  %v4416_v36 = vld [vmem:[%s5428_s5 + $0x58] sm:$0xff]  }
 0x1d6   :  { %1519 = vmatprep.subr.bf16.mxu1 %v4626_v0 }
 0x1d8   :  { %1372 = vmatmul.mubr.bf16.vlgmr.msra.gmra.mrb[4].mxu1 %v3763_v19  ;;  %v4388_v19 = vld [vmem:[#allocation8 + $0xf8] sm:$0xff]  }
 0x1d9   :  { %1520 = vmatpush1.bf16.msra.mxu1 %v4381_v37  ;;  %3792 = vmatprep.mubr.msk.bf16.mxu1 %vm1210_vm7, %v3779_v12 }
 0x1da   :  { %1521 = vmatprep.subr.bf16.mxu1 %v4626_v0 }
 0x1dd   :  { %1522 = vmatpush1.bf16.msra.mxu1 %v4382_v38 }
 0x1de   :  { %1523 = vmatprep.subr.bf16.mxu1 %v4626_v0 }
 0x1e1   :  { %1524 = vmatpush1.bf16.msra.mxu1 %v4383_v39 }
 0x1e2   :  { %1525 = vmatprep.subr.bf16.mxu1 %v4626_v0 }
 0x1e5   :  { %1526 = vmatpush1.bf16.msra.mxu1 %v4384_v40 }
 0x1e6   :  { %1527 = vmatprep.subr.bf16.mxu1 %v4626_v0 }
 0x1e9   :  { %1528 = vmatpush1.bf16.msra.mxu1 %v4385_v42 }
 0x1ea   :  { %1529 = vmatprep.subr.bf16.mxu1 %v4626_v0 }
 0x1ed   :  { %1530 = vmatpush1.bf16.msra.mxu1 %v4386_v7 }
 0x1ee   :  { %1531 = vmatprep.subr.bf16.mxu1 %v4626_v0 }
 0x1f1   :  { %1532 = vmatpush1.bf16.msra.mxu1 %v4387_v14 }
 0x1f2   :  { %1533 = vmatprep.subr.bf16.mxu1 %v4626_v0 }
 0x1f5   :  { %1534 = vmatpush1.bf16.msra.mxu1 %v4388_v19 }
 0x1f6   :  { %1535 = vmatprep.subr.bf16.mxu1 %v4626_v0 }
 0x1f9   :  { %1536 = vmatpush1.bf16.msra.mxu1 %v4389_v43 }
 0x1fa   :  { %1537 = vmatprep.subr.bf16.mxu1 %v4626_v0 }
 0x1fd   :  { %1538 = vmatpush1.bf16.msra.mxu1 %v4390_v44  ;;  %v3825_v44 = vld [vmem:[%s5427_s4] ss:$0 sm:$0xff] }
 0x1fe   :  { %1539 = vmatprep.subr.bf16.mxu1 %v4626_v0 }
 0x201   :  { %1540 = vmatpush1.bf16.msra.mxu1 %v4391_v45 }
 0x202   :  { %1541 = vmatprep.subr.bf16.mxu1 %v4626_v0 }
 0x205   :  { %1542 = vmatpush1.bf16.msra.mxu1 %v4392_v52 }
 0x206   :  { %1868 = vmatprep.subr.bf16.mxu1 %v4626_v0 }
 0x208   :  { %1552 = vmatmul.mubr.bf16.vlgmr.msra.gmra.mrb[8].mxu1 %v3778_v13 }
 0x209   :  { %1869 = vmatpush1.bf16.msra.mxu1 %v4393_v58  ;;  %3824 = vmatprep.mubr.msk.bf16.mxu1 %vm1210_vm7, %v3811_v59 }
 0x20a   :  { %1870 = vmatprep.subr.bf16.mxu1 %v4626_v0 }
 0x20d   :  { %1871 = vmatpush1.bf16.msra.mxu1 %v4394_v41 }
 0x20e   :  { %1872 = vmatprep.subr.bf16.mxu1 %v4626_v0 }
 0x211   :  { %1873 = vmatpush1.bf16.msra.mxu1 %v4395_v60 }
 0x212   :  { %1874 = vmatprep.subr.bf16.mxu1 %v4626_v0 }
 0x215   :  { %1875 = vmatpush1.bf16.msra.mxu1 %v4396_v49 }
 0x216   :  { %1876 = vmatprep.subr.bf16.mxu1 %v4626_v0 }
 0x219   :  { %1877 = vmatpush1.bf16.msra.mxu1 %v4397_v61 }
 0x21a   :  { %1878 = vmatprep.subr.bf16.mxu1 %v4626_v0 }
 0x21d   :  { %1879 = vmatpush1.bf16.msra.mxu1 %v4398_v63 }
 0x21e   :  { %1880 = vmatprep.subr.bf16.mxu1 %v4626_v0 }
 0x221   :  { %1881 = vmatpush1.bf16.msra.mxu1 %v4399_v26 }
 0x222   :  { %1882 = vmatprep.subr.bf16.mxu1 %v4626_v0 }
 0x225   :  { %1883 = vmatpush1.bf16.msra.mxu1 %v4400_v1 }
 0x226   :  { %1884 = vmatprep.subr.bf16.mxu1 %v4626_v0 }
 0x229   :  { %1885 = vmatpush1.bf16.msra.mxu1 %v4401_v2 }
 0x22a   :  { %1886 = vmatprep.subr.bf16.mxu1 %v4626_v0 }
 0x22d   :  { %1887 = vmatpush1.bf16.msra.mxu1 %v4402_v3 }
 0x22e   :  { %1888 = vmatprep.subr.bf16.mxu1 %v4626_v0 }
 0x231   :  { %1889 = vmatpush1.bf16.msra.mxu1 %v4403_v4 }
 0x232   :  { %1890 = vmatprep.subr.bf16.mxu1 %v4626_v0  ;;  %v4414_v0 = vld [vmem:[%s5428_s5 + $0x50] sm:$0xff]  }
 0x233   :  { %4140 = vmatpush3.bf16.msra.mxu0 %v4414_v0 }
 0x234   :  { %4141 = vmatprep.subr.bf16.mxu0 %v4627_v17 }
 0x235   :  { %1891 = vmatpush1.bf16.msra.mxu1 %v4404_v5 }
 0x236   :  { %4163 = vmatprep.subr.bf16.mxu1 %v4627_v17 }
 0x237   :  { %4142 = vmatpush3.bf16.msra.mxu0 %v4416_v36 }
 0x238   :  { %1901 = vmatmul.mubr.bf16.vlgmr.msra.gmra.mrb[12].mxu1 %v3810_v6  ;;  %4147 = vmatprep.subr.bf16.mxu0 %v4627_v17 }
 0x239   :  { %4164 = vmatpush3.bf16.msra.mxu1 %v4405_v16  ;;  %4175 = vmatprep.mubr.msk.bf16.mxu1 %vm4628_vm13, %v4627_v17 }
 0x23a   :  { %4165 = vmatprep.subr.bf16.mxu1 %v4627_v17 }
 0x23d   :  { %4166 = vmatpush3.bf16.msra.mxu1 %v4407_v25 }
 0x23e   :  { %4167 = vmatprep.subr.bf16.mxu1 %v4627_v17 }
 0x241   :  { %4168 = vmatpush3.bf16.msra.mxu1 %v4409_v30 }
 0x242   :  { %4169 = vmatprep.subr.bf16.mxu1 %v4627_v17 }
 0x245   :  { %4170 = vmatpush3.bf16.msra.mxu1 %v4411_v32  ;;  %v4417_v32 = vld [vmem:[%s5428_s5 + $0xc0] sm:$0xff]  }
 0x246   :  { %4171 = vmatprep.subr.bf16.mxu1 %v4627_v17 }
 0x249   :  { %4172 = vmatpush3.bf16.msra.mxu1 %v4413_v34 }
 0x24a   :  { %4173 = vmatprep.subr.bf16.mxu1 %v4627_v17 }
 0x24d   :  { %4174 = vmatpush3.bf16.msra.mxu1 %v4415_v35 }
 0x24e   :  { %4195 = vmatprep.subr.bf16.mxu1 %v4627_v17 }
 0x27b   :  { %v1248_v8 = vpop.f32.mrb[0].mxu1 }
 0x27c   :  { %v1250_v9 = vpop.f32.mrb[1].mxu1 }
 0x27d   :  { %v1251_v23 = vpop.f32.mrb[2].mxu1 }
 0x27e   :  { %v1253_v10 = vpop.f32.mrb[3].mxu1 }
 0x288   :  { %v1735_v11 = vpop.f32.mrb[8].mxu0 }
 0x289   :  { %v1737_v12 = vpop.f32.mrb[9].mxu0 }
 0x28a   :  { %v1738_v13 = vpop.f32.mrb[10].mxu0 }
 0x28b   :  { %v1740_v15 = vpop.f32.mrb[11].mxu0 }
 0x2ab   :  { %v1373_v18 = vpop.f32.mrb[4].mxu1 }
 0x2ac   :  { %v1374_v20 = vadd.f32 %v1373_v18, %v1248_v8  ;;  %v1375_v21 = vpop.f32.mrb[5].mxu1 }
 0x2ad   :  { %v1376_v22 = vpop.f32.mrb[6].mxu1 }
 0x2ae   :  { %v1377_v27 = vadd.f32 %v1376_v22, %v1251_v23  ;;  %v1378_v28 = vpop.f32.mrb[7].mxu1 }
 0x2db   :  { %v1553_v37 = vpop.f32.mrb[8].mxu1 }
 0x2dc   :  { %v1560_v38 = vadd.f32 %v1553_v37, %v1374_v20  ;;  %v1555_v39 = vpop.f32.mrb[9].mxu1 }
 0x2dd   :  { %v1556_v40 = vpop.f32.mrb[10].mxu1 }
 0x2de   :  { %v1561_v42 = vadd.f32 %v1556_v40, %v1377_v27  ;;  %v1558_v7 = vpop.f32.mrb[11].mxu1  ;;  %v1742_v14 = vadd.f32 %v1735_v11, %v1560_v38  ;;  %v4419_v38 = vld [vmem:[%s5428_s5 + $0xc8] sm:$0xff]   ;;  %v4418_v40 = vld [vmem:[%s5428_s5] sm:$0xff]  }
 0x2df   :  { %v4421_v7 = vld [vmem:[%s5428_s5 + $0xd0] sm:$0xff]  }
 0x2e0   :  { %v1743_v19 = vadd.f32 %v1738_v13, %v1561_v42 }
 0x30b   :  { %v1902_v43 = vpop.f32.mrb[12].mxu1 }
 0x30c   :  { %v1909_v45 = vadd.f32 %v1902_v43, %v1742_v14  ;;  %v1904_v47 = vpop.f32.mrb[13].mxu1  ;;  %v4423_v14 = vld [vmem:[%s5428_s5 + $0xd8] sm:$0xff]  }
 0x30d   :  { %v1905_v48 = vpop.f32.mrb[14].mxu1 }
 0x30e   :  { %v1918_v50 = vadd.f32 %v3825_v44, %v1909_v45  ;;  %v1910_v51 = vadd.f32 %v1905_v48, %v1743_v19  ;;  %v1907_v52 = vpop.f32.mrb[15].mxu1  ;;  %v4422_v19 = vld [vmem:[%s5428_s5 + $0x10] sm:$0xff]   ;;  %v4424_v45 = vld [vmem:[%s5428_s5 + $0x18] sm:$0xff]  }
 0x30f   :  { %v4427_v52 = vld [vmem:[%s5428_s5 + $0xe8] sm:$0xff]  }
 0x310   :  { %v3826_v54 = vmul.f32 -1.442695, %v1918_v50  ;;  %v1919_v55 = vadd.f32 %v3825_v44, %v1910_v51  ;;  %v4425_v44 = vld [vmem:[%s5428_s5 + $0xe0] sm:$0xff]  }
 0x312   :  { %4532 = vpow2.f32 %v3826_v54  ;;  %v3827_v57 = vmul.f32 -1.442695, %v1919_v55 }
 0x314   :  { %4534 = vpow2.f32 %v3827_v57  ;;  %v4426_v57 = vld [vmem:[%s5428_s5 + $0x20] sm:$0xff]  }
 0x31c   :  { %v4533_v58 = vpop.eup %4532 }
 0x31d   :  { %v1926_v53 = vadd.f32 1.0, %v4533_v58 }
 0x31e   :  { %v4535_v59 = vpop.eup %4534 }
 0x31f   :  { %4536 = vrcp.f32 %v1926_v53  ;;  %v1927_v41 = vadd.f32 1.0, %v4535_v59 }
 0x321   :  { %4538 = vrcp.f32 %v1927_v41 }
 0x329   :  { %v4537_v60 = vpop.eup %4536 }
 0x32a   :  { %v4004_v49 = vpack.c.bf16 %v4537_v60, %v4537_v60  ;;  %v4428_v60 = vld [vmem:[%s5428_s5 + $0x28] sm:$0xff]  }
 0x32b   :  { %v4539_v61 = vpop.eup %4538 }
 0x32c   :  { %v1938_v63 = vrot.slane %v4004_v49, 7  ;;  %v4005_v26 = vpack.c.bf16 %v4539_v61, %v4539_v61  ;;  %v4429_v49 = vld [vmem:[%s5428_s5 + $0x90] sm:$0xff]  }
 0x32e   :  { %v1939_v1 = vrot.slane %v1938_v63, 4  ;;  %1947 = vst.msk [vmem:[#allocation3] sm:$0xe] %vm1946_vm14, %v1938_v63  ;;  %v1940_v2 = vrot.slane %v4005_v26, 7  ;;  %v4430_v63 = vld [vmem:[%s5428_s5 + $0x98] sm:$0xff]  }
 0x330   :  { %1948 = vst.msk [vmem:[#allocation3 + $0x4] sm:$0x1] %vm98_vm11, %v1939_v1  ;;  %v1941_v3 = vrot.slane %v1940_v2, 4 }
 0x331   :  { %1949 = vst.msk [vmem:[#allocation3 + $0x8] sm:$0xe] %vm1946_vm14, %v1940_v2  ;;  %v4431_v2 = vld [vmem:[%s5428_s5 + $0xa0] sm:$0xff]  }
 0x332   :  { %1950 = vst.msk [vmem:[#allocation3 + $0xc] sm:$0x1] %vm98_vm11, %v1941_v3 }
 0x335   :  { %v5067_v4 = vld [vmem:[#allocation3] sm:$0xf] }
 0x336   :  { %v5069_v5 = vld [vmem:[#allocation3] sm:$0xe]  ;;  %v1968_v6 = vshrl.u32 %v5067_v4, 16  ;;  %v1971_v8 = vshll.u32 %v5067_v4, 16 }
 0x337   :  { %v1965_v9 = vld [vmem:[#allocation3 + $0x4] sm:$0x1]  ;;  %v3858_v20 = vrot.slane %v5069_v5, 9  ;;  %v2427_v51 = vld [vmem:[#allocation3] sm:$0xc]  ;;  %v2294_v3 = vshrl.u32 %v5069_v5, 16 }
 0x338   :  { %v5073_v23 = vld [vmem:[#allocation3 + $0x8] sm:$0xe]  ;;  %v2184_v11 = vrot.slane %v1965_v9, 5  ;;  %v1970_v12 = vrot.slane %v1968_v6, 4  ;;  %v1973_v13 = vrot.slane %v1971_v8, 5  ;;  %v1977_v25 = vshll.u32 %v1965_v9, 16 }
 0x339   :  { %v5075_v10 = vld [vmem:[#allocation3 + $0x8] sm:$0xf]  ;;  %v1966_v15 = vld [vmem:[#allocation3 + $0xc] sm:$0x1]  ;;  %v3859_v21 = vrot.slane %v5073_v23, 9  ;;  %v3900_v58 = vrot.slane %v2427_v51, 10 }
 0x33a   :  { %v1982_v16 = vshrl.u32 %v5075_v10, 16  ;;  %v1985_v18 = vshll.u32 %v5075_v10, 16  ;;  %v2188_v22 = vrot.slane %v1966_v15, 5  ;;  %v1974_v24 = vor.u32 %v1973_v13, %v1970_v12  ;;  %v2289_v43 = vld [vmem:[#allocation3 + $0xc] sm:$0x3] }
 0x33b   :  { %v1991_v29 = vshll.u32 %v1966_v15, 16  ;;  %v2185_v30 = vsel %vm4978_vm10, %v3858_v20, %v2184_v11  ;;  %v1979_v35 = vrot.slane %v1977_v25, 5  ;;  %v2288_v47 = vld [vmem:[#allocation3 + $0x4] sm:$0x3]  ;;  %v2428_v48 = vld [vmem:[#allocation3 + $0x8] sm:$0xc]  ;;  %v3850_v61 = vcombine.low %v5067_v4, %v5075_v10 }
 0x33c   :  { %v1984_v27 = vrot.slane %v1982_v16, 4  ;;  %v1987_v28 = vrot.slane %v1985_v18, 5  ;;  %v2189_v31 = vsel %vm4978_vm10, %v3859_v21, %v2188_v22  ;;  %v1975_v34 = vrot.slane %v1974_v24, 4  ;;  %v4433_v20 = vld [vmem:[%s5428_s5 + $0xb0] sm:$0xff]   ;;  %v4457_v51 = vld [vmem:[%s5430_s7 + $0xe8] sm:$0xff]  }
 0x33d   :  { %v3872_v33 = vcombine.low %v2185_v30, %v2189_v31  ;;  %v1993_v37 = vrot.slane %v1991_v29, 5  ;;  %v2442_v50 = vrot.slane %v2289_v43, 6  ;;  %v2438_v54 = vrot.slane %v2288_v47, 6 }
 0x33e   :  { %v1988_v0 = vor.u32 %v1987_v28, %v1984_v27  ;;  %v1980_v56 = vsel %vm4801_vm3, %v1975_v34, %v1979_v35  ;;  %v3901_v55 = vrot.slane %v2428_v48, 10  ;;  %v2312_v26 = vshrl.u32 %v5073_v23, 16  ;;  %v4434_v28 = vld [vmem:[%s5428_s5 + $0xb8] sm:$0xff]   ;;  %v4435_v34 = vld [vmem:[%s5430_s7 + $0x40] sm:$0xff]  }
 0x33f   :  { %4176 = vmatmul.mubr.msk.bf16.vlgmr.msra.gmra.mrb[16].mxu1 %vm220_vm0, %v3872_v33  ;;  %v2315_v1 = vshll.u32 %v5073_v23, 16  ;;  %v2297_v4 = vshll.u32 %v5069_v5, 16  ;;  %v2321_v9 = vshrl.u32 %v2289_v43, 16  ;;  %v2324_v10 = vshll.u32 %v2289_v43, 16  ;;  %v4432_v23 = vld [vmem:[%s5428_s5 + $0xa8] sm:$0xff]   ;;  %v4438_v35 = vld [vmem:[%s5430_s7 + $0x80] sm:$0xff]  }
 0x340   :  { %v1989_v36 = vrot.slane %v1988_v0, 4  ;;  %4196 = vmatpush3.bf16.msra.mxu1 %v4417_v32  ;;  %4207 = vmatprep.mubr.msk.bf16.mxu1 %vm4628_vm13, %v4627_v17  ;;  %v2314_v6 = vrot.slane %v2312_v26, 5  ;;  %v2296_v11 = vrot.slane %v2294_v3, 5  ;;  %v2303_v13 = vshrl.u32 %v2288_v47, 16  ;;  %v4436_v0 = vld [vmem:[%s5430_s7] sm:$0xff]   ;;  %v4450_v43 = vld [vmem:[%s5430_s7 + $0x98] sm:$0xff]  }
 0x341   :  { %4197 = vmatprep.subr.bf16.mxu1 %v4627_v17  ;;  %v2317_v8 = vrot.slane %v2315_v1, 6  ;;  %v2299_v12 = vrot.slane %v2297_v4, 6  ;;  %v2306_v15 = vshll.u32 %v2288_v47, 16  ;;  %v2323_v18 = vrot.slane %v2321_v9, 5  ;;  %v4453_v47 = vld [vmem:[%s5430_s7 + $0xe0] sm:$0xff]  }
 0x342   :  { %v1994_v39 = vsel %vm4801_vm3, %v1989_v36, %v1993_v37  ;;  %vm2433_vm3 = vcmask 1041408   ;;  %v2326_v5 = vrot.slane %v2324_v10, 6  ;;  %v2305_v22 = vrot.slane %v2303_v13, 5  ;;  %v4439_v36 = vld [vmem:[%s5430_s7 + $0x48] sm:$0xff]   ;;  %v4454_v48 = vld [vmem:[%s5430_s7 + $0xa0] sm:$0xff]  }
 0x343   :  { %v3842_v42 = vcombine.low %v1980_v56, %v1994_v39  ;;  %vm2435_vm1 = vmor %vm2433_vm3, %vm2434_vm15  ;;  %v2318_v16 = vor.u32 %v2317_v8, %v2314_v6  ;;  %v2300_v21 = vor.u32 %v2299_v12, %v2296_v11  ;;  %v2308_v24 = vrot.slane %v2306_v15, 6  ;;  %v4440_v37 = vld [vmem:[%s5430_s7 + $0x8] sm:$0xff]   ;;  %v4443_v39 = vld [vmem:[%s5430_s7 + $0x50] sm:$0xff]  }
 0x344   :  { %4198 = vmatpush3.bf16.msra.mxu1 %v4419_v38  ;;  %v2443_v53 = vsel %vm2435_vm1, %v3901_v55, %v2442_v50  ;;  %v2439_v59 = vsel %vm2435_vm1, %v3900_v58, %v2438_v54  ;;  %v2327_v27 = vor.u32 %v2326_v5, %v2323_v18  ;;  %v4441_v38 = vld [vmem:[%s5430_s7 + $0xc8] sm:$0xff]   ;;  %v4459_v54 = vld [vmem:[%s5430_s7 + $0x70] sm:$0xff]   ;;  %v4470_v3 = vld [vmem:[%s5430_s7 + $0x1c0] sm:$0xff]  }
 0x345   :  { %4144 = vmatmul.mubr.msk.bf16.vlgmr.msra.gmra.mrb[12].mxu0 %vm220_vm0, %v3842_v42  ;;  %4199 = vmatprep.subr.bf16.mxu1 %v4627_v17  ;;  %v3914_v41 = vcombine.low %v2439_v59, %v2443_v53  ;;  %v2319_v25 = vrot.slane %v2318_v16, 4  ;;  %v2301_v29 = vrot.slane %v2300_v21, 4  ;;  %v2309_v30 = vor.u32 %v2308_v24, %v2305_v22  ;;  %v4442_v56 = vld [vmem:[%s5430_s7 + $0x88] sm:$0xff]   ;;  %v4445_v42 = vld [vmem:[%s5430_s7 + $0xd0] sm:$0xff]   ;;  %v4463_v53 = vld [vmem:[%s5430_s7 + $0x78] sm:$0xff]  }
 0x346   :  { %4148 = vmatpush3.bf16.msra.mxu0 %v4418_v40  ;;  %4159 = vmatprep.mubr.msk.bf16.mxu0 %vm4628_vm13, %v4627_v17  ;;  %v4444_v40 = vld [vmem:[%s5430_s7 + $0x10] sm:$0xff]   ;;  %v4455_v50 = vld [vmem:[%s5430_s7 + $0x68] sm:$0xff]  }
 0x347   :  { %4149 = vmatprep.subr.bf16.mxu0 %v4627_v17  ;;  %v2328_v31 = vsel %vm2292_vm5, %v2319_v25, %v2327_v27  ;;  %v2310_v32 = vsel %vm2292_vm5, %v2301_v29, %v2309_v30  ;;  %v4458_v55 = vld [vmem:[%s5430_s7 + $0xa8] sm:$0xff]   ;;  %v4460_v58 = vld [vmem:[%s5430_s7 + $0x30] sm:$0xff]  }
 0x348   :  { %4200 = vmatpush3.bf16.msra.mxu1 %v4421_v7  ;;  %v3892_v33 = vcombine.low %v2310_v32, %v2328_v31  ;;  %v4446_v7 = vld [vmem:[%s5430_s7 + $0x90] sm:$0xff]  }
 0x349   :  { %4201 = vmatprep.subr.bf16.mxu1 %v4627_v17  ;;  %v4462_v59 = vld [vmem:[%s5430_s7 + $0xb0] sm:$0xff]  }
 0x34a   :  { %4150 = vmatpush3.bf16.msra.mxu0 %v4420_v46  ;;  %v4447_v46 = vld [vmem:[%s5430_s7 + $0x58] sm:$0xff]  }
 0x34b   :  { %4151 = vmatprep.subr.bf16.mxu0 %v4627_v17 }
 0x34c   :  { %4202 = vmatpush3.bf16.msra.mxu1 %v4423_v14  ;;  %v4448_v14 = vld [vmem:[%s5430_s7 + $0x18] sm:$0xff]  }
 0x34d   :  { %4203 = vmatprep.subr.bf16.mxu1 %v4627_v17 }
 0x34e   :  { %4152 = vmatpush3.bf16.msra.mxu0 %v4422_v19  ;;  %v4449_v19 = vld [vmem:[%s5430_s7 + $0xd8] sm:$0xff]  }
 0x34f   :  { %4153 = vmatprep.subr.bf16.mxu0 %v4627_v17 }
 0x350   :  { %4204 = vmatpush3.bf16.msra.mxu1 %v4425_v44  ;;  %v4451_v44 = vld [vmem:[%s5430_s7 + $0x60] sm:$0xff]  }
 0x351   :  { %4205 = vmatprep.subr.bf16.mxu1 %v4627_v17 }
 0x352   :  { %4154 = vmatpush3.bf16.msra.mxu0 %v4424_v45  ;;  %v4452_v45 = vld [vmem:[%s5430_s7 + $0x20] sm:$0xff]  }
 0x353   :  { %4155 = vmatprep.subr.bf16.mxu0 %v4627_v17 }
 0x354   :  { %4206 = vmatpush3.bf16.msra.mxu1 %v4427_v52  ;;  %v4456_v52 = vld [vmem:[%s5430_s7 + $0x28] sm:$0xff]  }
 0x356   :  { %4156 = vmatpush3.bf16.msra.mxu0 %v4426_v57  ;;  %v4461_v57 = vld [vmem:[%s5430_s7 + $0xf0] sm:$0xff]  }
 0x357   :  { %4157 = vmatprep.subr.bf16.mxu0 %v4627_v17  ;;  %4208 = vmatmul.mubr.msk.bf16.vlgmr.msra.gmra.mrb[20].mxu1 %vm220_vm0, %v3914_v41  ;;  %v4465_v41 = vld [vmem:[%s5430_s7 + $0xf8] sm:$0xff]  }
 0x35a   :  { %4158 = vmatpush3.bf16.msra.mxu0 %v4428_v60  ;;  %v4464_v60 = vld [vmem:[%s5430_s7 + $0x38] sm:$0xff]  }
 0x35b   :  { %4179 = vmatprep.subr.bf16.mxu0 %v4627_v17 }
 0x35d   :  { %4160 = vmatmul.mubr.msk.bf16.vlgmr.msra.gmra.mrb[16].mxu0 %vm220_vm0, %v3850_v61 }
 0x35e   :  { %4180 = vmatpush3.bf16.msra.mxu0 %v4429_v49  ;;  %4191 = vmatprep.mubr.msk.bf16.mxu0 %vm4628_vm13, %v4627_v17  ;;  %v4466_v49 = vld [vmem:[%s5430_s7 + $0xb8] sm:$0xff]  }
 0x35f   :  { %4181 = vmatprep.subr.bf16.mxu0 %v4627_v17 }
 0x362   :  { %4182 = vmatpush3.bf16.msra.mxu0 %v4430_v63  ;;  %v4467_v63 = vld [vmem:[%s5430_s7 + $0x140] sm:$0xff]  }
 0x363   :  { %4183 = vmatprep.subr.bf16.mxu0 %v4627_v17 }
 0x366   :  { %4184 = vmatpush3.bf16.msra.mxu0 %v4431_v2 }
 0x367   :  { %4185 = vmatprep.subr.bf16.mxu0 %v4627_v17 }
 0x36a   :  { %4186 = vmatpush3.bf16.msra.mxu0 %v4432_v23 }
 0x36b   :  { %4187 = vmatprep.subr.bf16.mxu0 %v4627_v17 }
 0x36e   :  { %4188 = vmatpush3.bf16.msra.mxu0 %v4433_v20 }
 0x36f   :  { %4189 = vmatprep.subr.bf16.mxu0 %v4627_v17  ;;  %v4437_v17 = vld [vmem:[%s5430_s7 + $0xc0] sm:$0xff]  }
 0x370   :  { %4065 = vmatprep.subr.bf16.mxu1 %v4437_v17 }
 0x371   :  { %4066 = vmatpush3.bf16.msra.mxu1 %v4438_v35 }
 0x372   :  { %4190 = vmatpush3.bf16.msra.mxu0 %v4434_v28  ;;  %4067 = vmatprep.subr.bf16.mxu1 %v4441_v38  ;;  %v3922_v28 = vld [vmem:[%s5429_s6] ss:$0 sm:$0xff] }
 0x373   :  { %4043 = vmatprep.subr.bf16.mxu0 %v4435_v34 }
 0x375   :  { %4192 = vmatmul.mubr.msk.bf16.vlgmr.msra.gmra.mrb[20].mxu0 %vm220_vm0, %v3892_v33  ;;  %4068 = vmatpush3.bf16.msra.mxu1 %v4442_v56  ;;  %vm2628_vm0 = vcmask 1041409  }
 0x376   :  { %4044 = vmatpush3.bf16.msra.mxu0 %v4436_v0  ;;  %4069 = vmatprep.subr.bf16.mxu1 %v4445_v42 }
 0x377   :  { %4045 = vmatprep.subr.bf16.mxu0 %v4439_v36 }
 0x379   :  { %4070 = vmatpush3.bf16.msra.mxu1 %v4446_v7  ;;  %v4630_v7 = vmov 1935823168  }
 0x37a   :  { %4046 = vmatpush3.bf16.msra.mxu0 %v4440_v37  ;;  %4071 = vmatprep.subr.bf16.mxu1 %v4449_v19 }
 0x37b   :  { %4047 = vmatprep.subr.bf16.mxu0 %v4443_v39  ;;  %v4629_v39 = vmov 1966171168  }
 0x37d   :  { %4072 = vmatpush3.bf16.msra.mxu1 %v4450_v43 }
 0x37e   :  { %4048 = vmatpush3.bf16.msra.mxu0 %v4444_v40  ;;  %4073 = vmatprep.subr.bf16.mxu1 %v4453_v47  ;;  %v2570_v40 = vunpack.c.l.s4 %v4629_v39 }
 0x37f   :  { %4049 = vmatprep.subr.bf16.mxu0 %v4447_v46  ;;  %v2598_v46 = vunpack.c.l.s4 %v4630_v7 }
 0x380   :  { %v2571_v42 = vunpack.c.0.s8 %v2570_v40 }
 0x381   :  { %4074 = vmatpush3.bf16.msra.mxu1 %v4454_v48  ;;  %v2599_v19 = vunpack.c.0.s8 %v2598_v46 }
 0x382   :  { %4050 = vmatpush3.bf16.msra.mxu0 %v4448_v14  ;;  %4075 = vmatprep.subr.bf16.mxu1 %v4457_v51  ;;  %v5282_v14 = vsub.s32 %v2571_v42, %v4887_v62 }
 0x383   :  { %4051 = vmatprep.subr.bf16.mxu0 %v4451_v44  ;;  %v2602_v47 = vsub.s32 %v2599_v19, %v4887_v62 }
 0x385   :  { %4076 = vmatpush3.bf16.msra.mxu1 %v4458_v55 }
 0x386   :  { %4052 = vmatpush3.bf16.msra.mxu0 %v4452_v45  ;;  %4077 = vmatprep.subr.bf16.mxu1 %v4461_v57 }
 0x387   :  { %4053 = vmatprep.subr.bf16.mxu0 %v4455_v50 }
 0x389   :  { %4078 = vmatpush3.bf16.msra.mxu1 %v4462_v59 }
 0x38a   :  { %4054 = vmatpush3.bf16.msra.mxu0 %v4456_v52  ;;  %4079 = vmatprep.subr.bf16.mxu1 %v4465_v41 }
 0x38b   :  { %4055 = vmatprep.subr.bf16.mxu0 %v4459_v54 }
 0x38d   :  { %4080 = vmatpush3.bf16.msra.mxu1 %v4466_v49 }
 0x38e   :  { %4056 = vmatpush3.bf16.msra.mxu0 %v4460_v58  ;;  %4109 = vmatprep.subr.bf16.mxu1 %v4470_v3 }
 0x38f   :  { %4057 = vmatprep.subr.bf16.mxu0 %v4463_v53 }
 0x392   :  { %4058 = vmatpush3.bf16.msra.mxu0 %v4464_v60 }
 0x393   :  { %4087 = vmatprep.subr.bf16.mxu0 %v4467_v63 }
 0x412   :  { %v2279_v61 = vpop.f32.mrb[16].mxu1 }
 0x413   :  { %v4177_v26 = vpop.f32.mrb[17].mxu1 }
 0x414   :  { %v2282_v1 = vpop.f32.mrb[18].mxu1 }
 0x415   :  { %v4178_v2 = vpop.f32.mrb[19].mxu1 }
 0x418   :  { %v2084_v4 = vpop.f32.mrb[12].mxu0 }
 0x419   :  { %v4145_v6 = vpop.f32.mrb[13].mxu0 }
 0x41a   :  { %v2087_v8 = vpop.f32.mrb[14].mxu0 }
 0x41b   :  { %v4146_v9 = vpop.f32.mrb[15].mxu0 }
 0x42a   :  { %v2533_v10 = vpop.f32.mrb[20].mxu1 }
 0x42b   :  { %v4209_v23 = vpop.f32.mrb[21].mxu1 }
 0x42c   :  { %v2536_v11 = vpop.f32.mrb[22].mxu1 }
 0x42d   :  { %v4210_v12 = vpop.f32.mrb[23].mxu1 }
 0x430   :  { %v2169_v13 = vpop.f32.mrb[16].mxu0 }
 0x431   :  { %v2170_v15 = vadd.f32 %v2169_v13, %v2084_v4  ;;  %v4161_v16 = vpop.f32.mrb[17].mxu0 }
 0x432   :  { %v2172_v18 = vpop.f32.mrb[18].mxu0 }
 0x433   :  { %v2173_v5 = vadd.f32 %v2172_v18, %v2087_v8  ;;  %v4162_v20 = vpop.f32.mrb[19].mxu0  ;;  %v2286_v21 = vadd.f32 %v2279_v61, %v2170_v15 }
 0x435   :  { %v2287_v22 = vadd.f32 %v2282_v1, %v2173_v5 }
 0x448   :  { %v2418_v24 = vpop.f32.mrb[20].mxu0 }
 0x449   :  { %v2425_v25 = vadd.f32 %v2418_v24, %v2286_v21  ;;  %v4193_v27 = vpop.f32.mrb[21].mxu0 }
 0x44a   :  { %v2421_v29 = vpop.f32.mrb[22].mxu0 }
 0x44b   :  { %v2540_v30 = vadd.f32 %v2533_v10, %v2425_v25  ;;  %v2426_v31 = vadd.f32 %v2421_v29, %v2287_v22  ;;  %v4194_v32 = vpop.f32.mrb[23].mxu0 }
 0x44d   :  { %v2549_v33 = vadd.f32 %v3922_v28, %v2540_v30  ;;  %v2541_v34 = vadd.f32 %v2536_v11, %v2426_v31 }
 0x44f   :  { %v3923_v0 = vmul.f32 -1.442695, %v2549_v33  ;;  %v2550_v17 = vadd.f32 %v3922_v28, %v2541_v34 }
 0x451   :  { %4540 = vpow2.f32 %v3923_v0  ;;  %v3924_v35 = vmul.f32 -1.442695, %v2550_v17 }
 0x453   :  { %4542 = vpow2.f32 %v3924_v35 }
 0x45b   :  { %v4541_v36 = vpop.eup %4540 }
 0x45c   :  { %v2557_v37 = vadd.f32 1.0, %v4541_v36 }
 0x45d   :  { %v4543_v38 = vpop.eup %4542 }
 0x45e   :  { %4544 = vrcp.f32 %v2557_v37  ;;  %v2558_v56 = vadd.f32 1.0, %v4543_v38 }
 0x460   :  { %4546 = vrcp.f32 %v2558_v56 }
 0x468   :  { %v4545_v43 = vpop.eup %4544 }
 0x469   :  { %v4006_v44 = vpack.c.bf16 %v4545_v43, %v4545_v43 }
 0x46a   :  { %v4547_v45 = vpop.eup %4546 }
 0x46b   :  { %v2575_v48 = vrot.slane %v4006_v44, %v5282_v14  ;;  %v4007_v50 = vpack.c.bf16 %v4547_v45, %v4547_v45 }
 0x46d   :  { %v2582_v51 = vrot.slane %v2575_v48, %v5282_v14  ;;  %v2666_v52 = vcombine.high %v2575_v48, %v2575_v48  ;;  %v2589_v54 = vrot.slane %v4007_v50, %v5282_v14 }
 0x46f   :  { %v2603_v55 = vrot.slane %v2582_v51, %v2602_v47  ;;  %v2673_v57 = vrot.slane %v2666_v52, %v5282_v14  ;;  %v2750_v58 = vcombine.high %v2582_v51, %v2582_v51  ;;  %v2596_v53 = vrot.slane %v2589_v54, %v5282_v14 }
 0x470   :  { %v2674_v59 = vcombine.high %v2589_v54, %v2589_v54 }
 0x471   :  { %v2610_v41 = vrot.slane %v2603_v55, %v2602_v47  ;;  %v2688_v60 = vrot.slane %v2673_v57, %v2602_v47  ;;  %v2758_v49 = vrot.slane %v2750_v58, %v2602_v47  ;;  %v2820_v61 = vcombine.high %v2673_v57, %v2673_v57 }
 0x472   :  { %v2617_v62 = vrot.slane %v2596_v53, %v2602_v47  ;;  %v2681_v63 = vrot.slane %v2674_v59, %v5282_v14  ;;  %v2751_v26 = vcombine.high %v2596_v53, %v2596_v53 }
 0x473   :  { %v2625_v1 = vunpack.c.l.b16 %v2610_v41  ;;  %v2695_v2 = vrot.slane %v2688_v60, %v2602_v47  ;;  %v2765_v3 = vrot.slane %v2758_v49, %v2602_v47  ;;  %v2828_v4 = vrot.slane %v2820_v61, %v2602_v47  ;;  %v4468_v61 = vld [vmem:[%s5430_s7 + $0x100] sm:$0xff]  }
 0x474   :  { %v2624_v6 = vrot.slane %v2617_v62, %v2602_v47  ;;  %v2702_v8 = vrot.slane %v2681_v63, %v2602_v47  ;;  %v2772_v9 = vrot.slane %v2751_v26, %v2602_v47  ;;  %v2821_v10 = vcombine.high %v2681_v63, %v2681_v63 }
 0x475   :  { %v2647_v23 = vrot.slane %v2625_v1, 1  ;;  %v2710_v11 = vunpack.c.l.b16 %v2695_v2  ;;  %v2780_v12 = vunpack.c.l.b16 %v2765_v3  ;;  %v2835_v13 = vrot.slane %v2828_v4, %v2602_v47  ;;  %v4471_v2 = vld [vmem:[%s5430_s7 + $0x180] sm:$0xff]   ;;  %v4472_v3 = vld [vmem:[%s5430_s7 + $0x148] sm:$0xff]  }
 0x476   :  { %v2626_v15 = vunpack.c.l.b16 %v2624_v6  ;;  %v2709_v16 = vrot.slane %v2702_v8, %v2602_v47  ;;  %v2779_v18 = vrot.slane %v2772_v9, %v2602_v47  ;;  %v2842_v5 = vrot.slane %v2821_v10, %v2602_v47  ;;  %v4474_v6 = vld [vmem:[%s5430_s7 + $0x1c8] sm:$0xff]   ;;  %v4476_v9 = vld [vmem:[%s5430_s7 + $0x150] sm:$0xff]  }
 0x477   :  { %v2731_v20 = vrot.slane %v2710_v11, 1  ;;  %v2801_v21 = vrot.slane %v2780_v12, 1  ;;  %v2850_v22 = vunpack.c.l.b16 %v2835_v13  ;;  %v4475_v10 = vld [vmem:[%s5430_s7 + $0x188] sm:$0xff]   ;;  %v4479_v13 = vld [vmem:[%s5430_s7 + $0x190] sm:$0xff]  }
 0x478   :  { %v2627_v24 = vrot.slane %v2626_v15, 7  ;;  %v2648_v25 = vsel %vm2628_vm0, %v2626_v15, %v2647_v23  ;;  %v2711_v27 = vunpack.c.l.b16 %v2709_v16  ;;  %v2781_v28 = vunpack.c.l.b16 %v2779_v18  ;;  %v4478_v23 = vld [vmem:[%s5430_s7 + $0x1d0] sm:$0xff]   ;;  %v4482_v15 = vld [vmem:[%s5430_s7 + $0x1d8] sm:$0xff]   ;;  %v4484_v18 = vld [vmem:[%s5430_s7 + $0x160] sm:$0xff]  }
 0x479   :  { %v2871_v29 = vrot.slane %v2850_v22, 1  ;;  %v2649_v30 = vpack.c.b16 %v2648_v25, %v2648_v25  ;;  %v2849_v31 = vrot.slane %v2842_v5, %v2602_v47  ;;  %v4481_v16 = vld [vmem:[%s5430_s7 + $0x118] sm:$0xff]   ;;  %v4490_v25 = vld [vmem:[%s5430_s7 + $0x1e8] sm:$0xff]  }
 0x47a   :  { %v2629_v32 = vsel %vm2628_vm0, %v2627_v24, %v2625_v1  ;;  %v2712_v33 = vrot.slane %v2711_v27, 7  ;;  %v2732_v34 = vsel %vm2628_vm0, %v2711_v27, %v2731_v20  ;;  %v2782_v0 = vrot.slane %v2781_v28, 7  ;;  %v4483_v5 = vld [vmem:[%s5430_s7 + $0x198] sm:$0xff]   ;;  %v4486_v20 = vld [vmem:[%s5430_s7 + $0x1e0] sm:$0xff]   ;;  %v4489_v27 = vld [vmem:[%s5430_s7 + $0x128] sm:$0xff]  }
 0x47b   :  { %v2630_v17 = vpack.c.b16 %v2629_v32, %v2629_v32  ;;  %v2656_v35 = vrot.slane %v2649_v30, %v5282_v14  ;;  %v2733_v36 = vpack.c.b16 %v2732_v34, %v2732_v34  ;;  %v2802_v37 = vsel %vm2628_vm0, %v2781_v28, %v2801_v21  ;;  %v4485_v21 = vld [vmem:[%s5430_s7 + $0x120] sm:$0xff]   ;;  %v4492_v28 = vld [vmem:[%s5430_s7 + $0x170] sm:$0xff]   ;;  %v4496_v32 = vld [vmem:[%s5430_s7 + $0x178] sm:$0xff]  }
 0x47c   :  { %v2713_v38 = vsel %vm2628_vm0, %v2712_v33, %v2710_v11  ;;  %v2783_v56 = vsel %vm2628_vm0, %v2782_v0, %v2780_v12  ;;  %v2803_v39 = vpack.c.b16 %v2802_v37, %v2802_v37  ;;  %v2851_v40 = vunpack.c.l.b16 %v2849_v31  ;;  %v4477_v11 = vld [vmem:[%s5430_s7 + $0x110] sm:$0xff]   ;;  %v4480_v12 = vld [vmem:[%s5430_s7 + $0x158] sm:$0xff]   ;;  %v4487_v24 = vld [vmem:[%s5430_s7 + $0x1a0] sm:$0xff]  }
 0x47d   :  { %v2637_v42 = vrot.slane %v2630_v17, %v5282_v14  ;;  %3928 = vst.sshfl [vmem:[#allocation4 + $0x1] sm:$0x1 pattern:$0x73625140] %v2656_v35  ;;  %v2714_v7 = vpack.c.b16 %v2713_v38, %v2713_v38  ;;  %v2740_v46 = vrot.slane %v2733_v36, %v5282_v14  ;;  %v2784_v19 = vpack.c.b16 %v2783_v56, %v2783_v56  ;;  %v4494_v30 = vld [vmem:[%s5430_s7 + $0x1f0] sm:$0xff]   ;;  %v4498_v34 = vld [vmem:[%s5430_s7 + $0x1f8] sm:$0xff]  }
 0x47e   :  { %v2810_v43 = vrot.slane %v2803_v39, %v5282_v14  ;;  %v2852_v44 = vrot.slane %v2851_v40, 7  ;;  %v2872_v45 = vsel %vm2628_vm0, %v2851_v40, %v2871_v29  ;;  %v4491_v29 = vld [vmem:[%s5430_s7 + $0x1a8] sm:$0xff]   ;;  %v4493_v31 = vld [vmem:[%s5430_s7 + $0x130] sm:$0xff]   ;;  %v4497_v0 = vld [vmem:[%s5430_s7 + $0x138] sm:$0xff]  }
 0x47f   :  { %3927 = vst.sshfl [vmem:[#allocation4] sm:$0x1 pattern:$0x73625140] %v2637_v42  ;;  %v2721_v47 = vrot.slane %v2714_v7, %v5282_v14  ;;  %v2791_v48 = vrot.slane %v2784_v19, %v5282_v14  ;;  %v2873_v50 = vpack.c.b16 %v2872_v45, %v2872_v45  ;;  %v4495_v33 = vld [vmem:[%s5430_s7 + $0x1b0] sm:$0xff]   ;;  %v4499_v17 = vld [vmem:[%s5430_s7 + $0x1b8] sm:$0xff]  }
 0x480   :  { %3930 = vst.sshfl [vmem:[#allocation4 + $0x3] sm:$0x1 pattern:$0x73625140] %v2740_v46  ;;  %v2853_v51 = vsel %vm2628_vm0, %v2852_v44, %v2850_v22  ;;  %v4488_v22 = vld [vmem:[%s5430_s7 + $0x168] sm:$0xff]  }
 0x481   :  { %3932 = vst.sshfl [vmem:[#allocation4 + $0x5] sm:$0x1 pattern:$0x73625140] %v2810_v43  ;;  %v2854_v52 = vpack.c.b16 %v2853_v51, %v2853_v51  ;;  %v2880_v54 = vrot.slane %v2873_v50, %v5282_v14  ;;  %v3935_v37 = vld [vmem:[%s5431_s8] ss:$0 sm:$0xff] }
 0x482   :  { %3929 = vst.sshfl [vmem:[#allocation4 + $0x2] sm:$0x1 pattern:$0x73625140] %v2721_v47 }
 0x483   :  { %3931 = vst.sshfl [vmem:[#allocation4 + $0x4] sm:$0x1 pattern:$0x73625140] %v2791_v48  ;;  %v2861_v55 = vrot.slane %v2854_v52, %v5282_v14 }
 0x484   :  { %3934 = vst.sshfl [vmem:[#allocation4 + $0x7] sm:$0x1 pattern:$0x73625140] %v2880_v54 }
 0x485   :  { %3933 = vst.sshfl [vmem:[#allocation4 + $0x6] sm:$0x1 pattern:$0x73625140] %v2861_v55 }
 0x48c   :  { %v2890_v57 = vld [vmem:[#allocation4] sm:$0xff] }
 0x48d   :  { %v3034_v58 = vrot.slane %v2890_v57, %v5282_v14  ;;  %v3027_v53 = vcombine.high %v2890_v57, %v2890_v57 }
 0x48f   :  { %v3042_v59 = vcombine.high %v3034_v58, %v3034_v58  ;;  %v3041_v41 = vrot.slane %v3027_v53, %v5282_v14  ;;  %v3050_v60 = vrot.slane %v3034_v58, %v5282_v14 }
 0x491   :  { %v3064_v49 = vrot.slane %v3042_v59, %v5282_v14  ;;  %v3043_v62 = vcombine.high %v3041_v41, %v3041_v41  ;;  %v5315_v63 = vrot.slane %v3041_v41, %v5282_v14  ;;  %v3072_v4 = vcombine.high %v3050_v60, %v3050_v60 }
 0x493   :  { %3500 = vmatprep.mubr.bf16.mxu0 %v3064_v49  ;;  %v3074_v26 = vcombine.high %v3064_v49, %v3064_v49  ;;  %v3071_v1 = vrot.slane %v3043_v62, %v5282_v14  ;;  %v4473_v14 = vld [vmem:[%s5430_s7 + $0x108] sm:$0xff]   ;;  %v3073_v35 = vcombine.high %v5315_v63, %v5315_v63  ;;  %s4631_s7 = smov [#allocation10]  }
 0x494   :  { %3501 = vmatmul.mubr.bf16.vlgmr.msra.gmra.mrb[24].mxu0 %v3050_v60  ;;  %s3635_s8 = sshll.u32 %s4631_s7, 4  ;;  %s3636_s8 = int_to_ptr.vmem [resolvable:$true] %s3635_s8 }
 0x495   :  { %4088 = vmatpush3.bf16.msra.mxu0 %v4468_v61  ;;  %3540 = vmatprep.mubr.bf16.mxu1 %v3074_v26  ;;  %v3075_v8 = vcombine.high %v3071_v1, %v3071_v1  ;;  %s4592_s13 = scalar_lea.vmem %s3636_s8, 32  ;;  %p4597_p3 = scmp.lt.s32.totalorder %s3636_s8, %s3636_s8 }
 0x496   :  { %3580 = vmatprep.mubr.bf16.mxu0 %v3071_v1  ;;  %3541 = vmatmul.mubr.bf16.vlgmr.msra.gmra.mrb[24].mxu1 %v3072_v4  ;;  %p4593_p2 = scmp.ne.s32.totalorder %s3636_s8, %s4592_s13  ;;  %p4598_p4 = scmp.lt.s32.totalorder %s4592_s13, %s4592_s13 }
 0x497   :  { %4110 = vmatpush3.bf16.msra.mxu1 %v4471_v2  ;;  %4089 = vmatprep.subr.bf16.mxu0 %v4472_v3 }
 0x498   :  { %3620 = vmatprep.mubr.bf16.mxu1 %v3075_v8  ;;  %4111 = vmatprep.subr.bf16.mxu1 %v4474_v6  ;;  %p4599_p5 = por %p4598_p4, %p4597_p3 }
 0x499   :  { %4090 = vmatpush3.bf16.msra.mxu0 %v4473_v14 }
 0x49a   :  { %4091 = vmatprep.subr.bf16.mxu0 %v4476_v9  ;;  %p4600_p6 = pnand %p4599_p5, %p4593_p2 }
 0x49b   :  { %4112 = vmatpush3.bf16.msra.mxu1 %v4475_v10 }
 0x49c   :  { %4113 = vmatprep.subr.bf16.mxu1 %v4478_v23 }
 0x49d   :  { %4092 = vmatpush3.bf16.msra.mxu0 %v4477_v11 }
 0x49e   :  { %4093 = vmatprep.subr.bf16.mxu0 %v4480_v12 }
 0x49f   :  { %4114 = vmatpush3.bf16.msra.mxu1 %v4479_v13 }
 0x4a0   :  { %4115 = vmatprep.subr.bf16.mxu1 %v4482_v15 }
 0x4a1   :  { %4094 = vmatpush3.bf16.msra.mxu0 %v4481_v16 }
 0x4a2   :  { %4095 = vmatprep.subr.bf16.mxu0 %v4484_v18 }
 0x4a3   :  { %4116 = vmatpush3.bf16.msra.mxu1 %v4483_v5 }
 0x4a4   :  { %4117 = vmatprep.subr.bf16.mxu1 %v4486_v20 }
 0x4a5   :  { %4096 = vmatpush3.bf16.msra.mxu0 %v4485_v21 }
 0x4a6   :  { %4097 = vmatprep.subr.bf16.mxu0 %v4488_v22 }
 0x4a7   :  { %4118 = vmatpush3.bf16.msra.mxu1 %v4487_v24 }
 0x4a8   :  { %4119 = vmatprep.subr.bf16.mxu1 %v4490_v25 }
 0x4a9   :  { %4098 = vmatpush3.bf16.msra.mxu0 %v4489_v27 }
 0x4aa   :  { %4099 = vmatprep.subr.bf16.mxu0 %v4492_v28 }
 0x4ab   :  { %4120 = vmatpush3.bf16.msra.mxu1 %v4491_v29 }
 0x4ac   :  { %4121 = vmatprep.subr.bf16.mxu1 %v4494_v30 }
 0x4ad   :  { %4100 = vmatpush3.bf16.msra.mxu0 %v4493_v31 }
 0x4ae   :  { %4101 = vmatprep.subr.bf16.mxu0 %v4496_v32 }
 0x4af   :  { %4122 = vmatpush3.bf16.msra.mxu1 %v4495_v33 }
 0x4b0   :  { %4123 = vmatprep.subr.bf16.mxu1 %v4498_v34 }
 0x4b1   :  { %4102 = vmatpush3.bf16.msra.mxu0 %v4497_v0 }
 0x4b3   :  { %4124 = vmatpush3.bf16.msra.mxu1 %v4499_v17 }
 0x4b4   :  { %3581 = vmatmul.mubr.bf16.vlgmr.msra.gmra.mrb[28].mxu0 %v5315_v63 }
 0x4b6   :  { %3621 = vmatmul.mubr.bf16.vlgmr.msra.gmra.mrb[28].mxu1 %v3073_v35 }
 0x567   :  { %v4059_v36 = vpop.f32.mrb[24].mxu0 }
 0x568   :  { %v4060_v38 = vpop.f32.mrb[25].mxu0 }
 0x569   :  { %v4061_v56 = vadd.f32 %v4060_v38, %v4059_v36  ;;  %v4062_v39 = vpop.f32.mrb[26].mxu0  ;;  %v4081_v40 = vpop.f32.mrb[24].mxu1 }
 0x56a   :  { %v4063_v42 = vpop.f32.mrb[27].mxu0  ;;  %v4082_v7 = vpop.f32.mrb[25].mxu1 }
 0x56b   :  { %v3503_v46 = vadd.f32 %v4061_v56, %v3935_v37  ;;  %v4083_v19 = vadd.f32 %v4082_v7, %v4081_v40  ;;  %v4084_v43 = vpop.f32.mrb[26].mxu1 }
 0x56c   :  { %v4085_v44 = vpop.f32.mrb[27].mxu1 }
 0x56d   :  { %v3543_v45 = vadd.f32 %v4083_v19, %v3503_v46 }
 0x587   :  { %v4103_v47 = vpop.f32.mrb[28].mxu0 }
 0x588   :  { %v4104_v48 = vpop.f32.mrb[29].mxu0 }
 0x589   :  { %v4105_v50 = vadd.f32 %v4104_v48, %v4103_v47  ;;  %v4106_v51 = vpop.f32.mrb[30].mxu0  ;;  %v4125_v52 = vpop.f32.mrb[28].mxu1 }
 0x58a   :  { %v4107_v54 = vpop.f32.mrb[31].mxu0  ;;  %v4126_v55 = vpop.f32.mrb[29].mxu1 }
 0x58b   :  { %v3583_v57 = vadd.f32 %v4105_v50, %v3543_v45  ;;  %v4127_v58 = vadd.f32 %v4126_v55, %v4125_v52  ;;  %v4128_v53 = vpop.f32.mrb[30].mxu1 }
 0x58c   :  { %v4129_v59 = vpop.f32.mrb[31].mxu1 }
 0x58d   :  { %v3623_v41 = vadd.f32 %v4127_v58, %v3583_v57 }
 0x58f   :  { %3628 = vst [vmem:[#allocation10] sm:$0x3] %v3623_v41 }
 0x590   :  { %4603 = shalt.err (!%p4600_p6)
}
 0x591   :  { %s4604_s15 = scalar_lea.hbm %s5432_s9, 32 }
 0x592   :  { %p4605_p7 = scmp.ne.s32.totalorder %s5432_s9, %s4604_s15  ;;  %p4608_p8 = scmp.lt.u32.totalorder %s4604_s15, %s5432_s9 }
 0x594   :  { %p4610_p9 = pnand %p4608_p8, %p4605_p7 }
 0x596   :  { %4613 = shalt.err (!%p4610_p9)
}
 0x597   :  { %3638 = dma.vmem_to_hbm [thread:$0]  %s3636_s8, 32, %s5432_s9, [#allocation7]  }
 0x598   :  { %4618 = dma.done.wait [#allocation7], 32  }
 0x599   :  { %4619 = vsyncadd [#allocation7], 4294967264 }
 0x59a   :  { %3642 = vsyncpa [#allocation6], 1 }
 0x59b   :  { %3643 = vsyncpa [#allocation9], 1 }
 0x59c   :  { %3644 = vsyncpa [#allocation7], 1 }

</bundles_post_ra>
